<compile_context>
chip_gen: v7x
topology: tpu7x:2x2x1
jax: 0.10.0
libtpu: 0.0.40
codegen_flags: <defaults>
</compile_context>

<pallas_src>
import functools

import jax
import jax.numpy as jnp
from jax.experimental import pallas as pl
from jax.experimental.pallas import tpu as pltpu


def _round_up(x, m):
    return ((x + m - 1) // m) * m


def _pick_time_block(T, cap=16):
    """Largest divisor of T that is <= cap (keeps in-kernel unroll bounded)."""
    best = 1
    for cand in range(1, min(T, cap) + 1):
        if T % cand == 0:
            best = cand
    return best


# --------------------------- fused per-layer kernel --------------------------

def _lstm_layer_kernel(x_ref, wih_ref, whh_ref, b_ref, h0_ref, c0_ref,
                       seq_ref, hn_ref, cn_ref, *, hidden, t_blk, num_dir):
    """One grid step = one direction x one block of T_BLK timesteps.

    x_ref:   (T_BLK, Bp, Din_p) bf16
    wih_ref: (Din_p, 4H) bf16   (resident; i/f/o columns pre-scaled by 1/2)
    whh_ref: (H, 4H)     bf16   (resident; i/f/o columns pre-scaled by 1/2)
    b_ref:   (1, 4H)     f32
    h0/c0:   (Bp, H)     f32    initial state for this direction
    seq_ref: (T_BLK, Bp, H) bf16 output hidden sequence block
    hn/cn:   (Bp, H)     f32    final state; also used as the resident carry
    """
    tb = pl.program_id(1)
    rev = pl.program_id(0)          # direction index; 1 == time-reversed dir

    @pl.when(tb == 0)
    def _():                        # load the initial (h, c) for this direction
        hn_ref[...] = h0_ref[...]
        cn_ref[...] = c0_ref[...]

    w_ih = wih_ref[...]
    w_hh = whh_ref[...]
    bias = b_ref[...]
    H = hidden

    def step(s, carry):
        h, c = carry                # (Bp, H) f32
        if num_dir == 1:
            local = s
        else:                       # fwd dir: s ; reverse dir: t_blk-1-s
            local = s + rev * (t_blk - 1 - 2 * s)
        x_t = x_ref[local]          # (Bp, Din_p) bf16
        z = (jnp.dot(x_t, w_ih, preferred_element_type=jnp.float32)
             + jnp.dot(h.astype(jnp.bfloat16), w_hh,
                       preferred_element_type=jnp.float32)
             + bias)                # (Bp, 4H) f32; i/f/o bands pre-scaled by 1/2
        act = jnp.tanh(z)           # single EUP pass over the full gate tile
        i = 0.5 * act[:, 0 * H:1 * H] + 0.5     # sigmoid via tanh identity
        f = 0.5 * act[:, 1 * H:2 * H] + 0.5
        g = act[:, 2 * H:3 * H]
        o = 0.5 * act[:, 3 * H:4 * H] + 0.5
        c = f * c + i * g
        h = o * jnp.tanh(c)
        seq_ref[local] = h.astype(seq_ref.dtype)
        return h, c

    h, c = jax.lax.fori_loop(0, t_blk, step, (hn_ref[...], cn_ref[...]),
                             unroll=True)
    hn_ref[...] = h                 # carries live in the direction-resident outputs
    cn_ref[...] = c


def _lstm_layer(x, w_ih_t, w_hh_t, bias, h0, c0, *, hidden, t_blk):
    """Run one (optionally bidirectional) LSTM layer.

    x:      (T, Bp, Din_p)        bf16 (Bp multiple of 8, Din_p multiple of 128)
    w_ih_t: (num_dir, Din_p, 4H)  bf16
    w_hh_t: (num_dir, H, 4H)      bf16
    bias:   (num_dir, 1, 4H)      f32
    h0,c0:  (num_dir, Bp, H)      f32
    Returns seq (num_dir, T, Bp, H) bf16, h_n, c_n (num_dir, Bp, H) f32.
    """
    T, Bp, din_p = x.shape
    num_dir = w_ih_t.shape[0]
    G = 4 * hidden
    assert T % t_blk == 0
    nb = T // t_blk

    def t_idx(d, tb):               # forward: tb ; reverse: nb-1-tb
        return tb + d * (nb - 1 - 2 * tb)

    dir_map = lambda d, tb: (d, 0, 0)

    kernel = functools.partial(_lstm_layer_kernel, hidden=hidden,
                               t_blk=t_blk, num_dir=num_dir)
    # NOTE: for very large hidden sizes, mark the resident weight specs with
    # pipeline_mode=pl.Buffered(1) and raise vmem_limit_bytes accordingly.
    return pl.pallas_call(
        kernel,
        out_shape=(
            jax.ShapeDtypeStruct((num_dir, T, Bp, hidden), jnp.bfloat16),
            jax.ShapeDtypeStruct((num_dir, Bp, hidden), jnp.float32),
            jax.ShapeDtypeStruct((num_dir, Bp, hidden), jnp.float32),
        ),
        grid=(num_dir, nb),
        in_specs=[
            pl.BlockSpec((t_blk, Bp, din_p), lambda d, tb: (t_idx(d, tb), 0, 0)),
            pl.BlockSpec((None, din_p, G), dir_map),
            pl.BlockSpec((None, hidden, G), dir_map),
            pl.BlockSpec((None, 1, G), dir_map),
            pl.BlockSpec((None, Bp, hidden), dir_map),
            pl.BlockSpec((None, Bp, hidden), dir_map),
        ],
        out_specs=(
            pl.BlockSpec((None, t_blk, Bp, hidden),
                         lambda d, tb: (d, t_idx(d, tb), 0, 0)),
            pl.BlockSpec((None, Bp, hidden), dir_map),
            pl.BlockSpec((None, Bp, hidden), dir_map),
        ),
        compiler_params=pltpu.CompilerParams(
            dimension_semantics=("parallel", "arbitrary"),
            vmem_limit_bytes=32 * 1024 * 1024),
    )(x, w_ih_t, w_hh_t, bias, h0, c0)


# --------------------------- parameter preparation ---------------------------

def _prepare_layer(params, layer, num_dir, hidden, din, din_p):
    """PyTorch-layout weights -> kernel-ready stacked/transposed/bf16 weights.

    The 1/2 of sigmoid(z) = 0.5*tanh(z/2)+0.5 is folded into the i/f/o gate
    rows of W_ih, W_hh and the bias; the kernel then only applies tanh.
    """
    G = 4 * hidden
    scale = jnp.concatenate([jnp.full((2 * hidden,), 0.5, jnp.float32),   # i, f
                             jnp.ones((hidden,), jnp.float32),            # g
                             jnp.full((hidden,), 0.5, jnp.float32)])      # o
    w_ih_l, w_hh_l, b_l = [], [], []
    for d in range(num_dir):
        p = params[f"l{layer}_d{d}"]
        assert p["w_ih"].shape == (G, din)
        w_ih = p["w_ih"] * scale[:, None]                       # (4H, din)
        w_hh = p["w_hh"] * scale[:, None]                       # (4H, H)
        b = (p["b_ih"] + p["b_hh"]) * scale                     # (4H,)
        w_ih_t = jnp.pad(jnp.transpose(w_ih), ((0, din_p - din), (0, 0)))
        w_ih_l.append(w_ih_t.astype(jnp.bfloat16))              # (din_p, 4H)
        w_hh_l.append(jnp.transpose(w_hh).astype(jnp.bfloat16)) # (H, 4H)
        b_l.append(b.reshape(1, G).astype(jnp.float32))
    return jnp.stack(w_ih_l), jnp.stack(w_hh_l), jnp.stack(b_l)


# ------------------------------- forward (JAX) -------------------------------

def lstm_forward(x, params, hidden_state=None, *, num_layers, hidden_dim,
                 bidirectional, time_block_cap=16):
    """x: (B, T, latent_dim) batch_first.

    Returns (y, (h_n, c_n)) with y: (B, T, hidden_dim * num_dir) and
    h_n, c_n: (num_layers * num_dir, B, hidden_dim)  (PyTorch layout).
    """
    B, T, _ = x.shape
    num_dir = 2 if bidirectional else 1
    Bp = max(8, _round_up(B, 8))                  # pad batch to sublane width
    t_blk = _pick_time_block(T, time_block_cap)

    cur = jnp.transpose(x, (1, 0, 2))             # time-major (T, B, D)
    cur = jnp.pad(cur, ((0, 0), (0, Bp - B), (0, 0)))

    h_all, c_all = [], []
    for layer in range(num_layers):
        din = cur.shape[-1]
        din_p = _round_up(din, 128)               # lane-align contraction dim
        w_ih_t, w_hh_t, bias = _prepare_layer(params, layer, num_dir,
                                              hidden_dim, din, din_p)
        xin = jnp.pad(cur, ((0, 0), (0, 0), (0, din_p - din))).astype(jnp.bfloat16)

        if hidden_state is None:
            h0 = jnp.zeros((num_dir, Bp, hidden_dim), jnp.float32)
            c0 = jnp.zeros_like(h0)
        else:
            h_full, c_full = hidden_state         # (num_layers*num_dir, B, H)
            sl = slice(layer * num_dir, (layer + 1) * num_dir)
            h0 = jnp.pad(h_full[sl], ((0, 0), (0, Bp - B), (0, 0))).astype(jnp.float32)
            c0 = jnp.pad(c_full[sl], ((0, 0), (0, Bp - B), (0, 0))).astype(jnp.float32)

        seq, h_n, c_n = _lstm_layer(xin, w_ih_t, w_hh_t, bias, h0, c0,
                                    hidden=hidden_dim, t_blk=t_blk)
        # (num_dir, T, Bp, H) -> (T, Bp, num_dir*H); stays bf16 between layers.
        cur = seq[0] if num_dir == 1 else jnp.concatenate([seq[0], seq[1]], -1)
        h_all.append(h_n[:, :B, :])
        c_all.append(c_n[:, :B, :])

    y = jnp.transpose(cur[:, :B, :], (1, 0, 2)).astype(jnp.float32)
    h_n = jnp.concatenate(h_all, axis=0)
    c_n = jnp.concatenate(c_all, axis=0)
    return y, (h_n, c_n)


# --------------------------- pure-JAX f32 reference ---------------------------

def _lstm_layer_ref(x, p, reverse):
    T, B, _ = x.shape
    H = p["w_hh"].shape[1]

    def step(carry, xt):
        h, c = carry
        z = xt @ p["w_ih"].T + p["b_ih"] + h @ p["w_hh"].T + p["b_hh"]
        i = jax.nn.sigmoid(z[:, 0:H])
        f = jax.nn.sigmoid(z[:, H:2 * H])
        g = jnp.tanh(z[:, 2 * H:3 * H])
        o = jax.nn.sigmoid(z[:, 3 * H:4 * H])
        c = f * c + i * g
        h = o * jnp.tanh(c)
        return (h, c), h

    init = (jnp.zeros((B, H), jnp.float32), jnp.zeros((B, H), jnp.float32))
    _, hs = jax.lax.scan(step, init, x, reverse=reverse)
    return hs


def lstm_forward_ref(x, params, *, num_layers, hidden_dim, bidirectional):
    num_dir = 2 if bidirectional else 1
    cur = jnp.transpose(x, (1, 0, 2)).astype(jnp.float32)
    for layer in range(num_layers):
        outs = [_lstm_layer_ref(cur, params[f"l{layer}_d{d}"], d == 1)
                for d in range(num_dir)]
        cur = outs[0] if num_dir == 1 else jnp.concatenate(outs, -1)
    return jnp.transpose(cur, (1, 0, 2))


# ---------------------------------- params -----------------------------------

def init_params(key, latent_dim, hidden_dim, num_layers, bidirectional):
    """PyTorch nn.LSTM layout & init: U(-1/sqrt(H), 1/sqrt(H))."""
    num_dir = 2 if bidirectional else 1
    bound = 1.0 / float(hidden_dim) ** 0.5
    params = {}
    keys = jax.random.split(key, num_layers * num_dir * 4)
    idx = 0
    for layer in range(num_layers):
        in_dim = latent_dim if layer == 0 else hidden_dim * num_dir
        for d in range(num_dir):
            kw_ih, kw_hh, kb_ih, kb_hh = keys[idx:idx + 4]
            idx += 4
            params[f"l{layer}_d{d}"] = {
                "w_ih": jax.random.uniform(kw_ih, (4 * hidden_dim, in_dim),
                                           jnp.float32, -bound, bound),
                "w_hh": jax.random.uniform(kw_hh, (4 * hidden_dim, hidden_dim),
                                           jnp.float32, -bound, bound),
                "b_ih": jax.random.uniform(kb_ih, (4 * hidden_dim,),
                                           jnp.float32, -bound, bound),
                "b_hh": jax.random.uniform(kb_hh, (4 * hidden_dim,),
                                           jnp.float32, -bound, bound),
            }
    return params


if __name__ == "__main__":
    key = jax.random.PRNGKey(0)
    k_x, k_p = jax.random.split(key)

    batch, seq, latent_dim, hidden_dim = 2, 8, 16, 32
    num_layers, bidirectional = 2, True

    x = jax.random.normal(k_x, (batch, seq, latent_dim), jnp.float32)
    params = init_params(k_p, latent_dim, hidden_dim, num_layers, bidirectional)

    fwd = jax.jit(functools.partial(lstm_forward, num_layers=num_layers,
                                    hidden_dim=hidden_dim,
                                    bidirectional=bidirectional))
    y, (h_n, c_n) = fwd(x, params)
    jax.block_until_ready((y, h_n, c_n))

    num_dir = 2 if bidirectional else 1
    assert y.shape == (batch, seq, hidden_dim * num_dir), y.shape
    assert h_n.shape == (num_layers * num_dir, batch, hidden_dim), h_n.shape
    assert c_n.shape == (num_layers * num_dir, batch, hidden_dim), c_n.shape
    assert bool(jnp.all(jnp.isfinite(y)))

    # Correctness vs. a pure-JAX f32 reference (kernel uses bf16 weights/acts).
    y_ref = lstm_forward_ref(x, params, num_layers=num_layers,
                             hidden_dim=hidden_dim, bidirectional=bidirectional)
    err = float(jnp.max(jnp.abs(y - y_ref)))
    assert err < 1e-1, f"max abs error vs f32 reference: {err}"

    print("KERNEL_OK")
</pallas_src>

<mosaic_0001>
module attributes {stable_mosaic.version = 11 : i64} {
  func.func @_lstm_layer_kernel(%arg0: i32, %arg1: i32, %arg2: memref<8x8x128xbf16, #tpu.memory_space<vmem>>, %arg3: memref<1x128x128xbf16, #tpu.memory_space<vmem>>, %arg4: memref<1x32x128xbf16, #tpu.memory_space<vmem>>, %arg5: memref<1x1x128xf32, #tpu.memory_space<vmem>>, %arg6: memref<1x8x32xf32, #tpu.memory_space<vmem>>, %arg7: memref<1x8x32xf32, #tpu.memory_space<vmem>>, %arg8: memref<1x8x8x32xbf16, #tpu.memory_space<vmem>>, %arg9: memref<1x8x32xf32, #tpu.memory_space<vmem>>, %arg10: memref<1x8x32xf32, #tpu.memory_space<vmem>>) attributes {dimension_semantics = [#tpu.dimension_semantics<parallel>, #tpu.dimension_semantics<arbitrary>], iteration_bounds = array<i64: 2, 1>, scalar_prefetch = 0 : i64, scratch_operands = 0 : i64, tpu.core_type = #tpu.core_type<tc>, window_params = [{transform_indices = @transform_0, window_bounds = array<i64: 8, 8, 128>}, {transform_indices = @transform_1, window_bounds = array<i64: 1, 128, 128>}, {transform_indices = @transform_2, window_bounds = array<i64: 1, 32, 128>}, {transform_indices = @transform_3, window_bounds = array<i64: 1, 1, 128>}, {transform_indices = @transform_4, window_bounds = array<i64: 1, 8, 32>}, {transform_indices = @transform_5, window_bounds = array<i64: 1, 8, 32>}, {transform_indices = @transform_6, window_bounds = array<i64: 1, 8, 8, 32>}, {transform_indices = @transform_7, window_bounds = array<i64: 1, 8, 32>}, {transform_indices = @transform_8, window_bounds = array<i64: 1, 8, 32>}]} {
    %c0_i32 = arith.constant 0 : i32
    %0 = arith.cmpi eq, %arg1, %c0_i32 : i32
    %1 = arith.extui %0 : i1 to i32
    %c0_i32_0 = arith.constant 0 : i32
    %2 = arith.cmpi ne, %1, %c0_i32_0 : i32
    scf.if %2 {
      %c0_141 = arith.constant 0 : index
      %c0_142 = arith.constant 0 : index
      %c0_143 = arith.constant 0 : index
      %339 = vector.load %arg6[%c0_141, %c0_142, %c0_143] : memref<1x8x32xf32, #tpu.memory_space<vmem>>, vector<1x8x32xf32>
      %340 = vector.shape_cast %339 : vector<1x8x32xf32> to vector<8x32xf32>
      %c0_144 = arith.constant 0 : index
      %c0_145 = arith.constant 0 : index
      %c0_146 = arith.constant 0 : index
      %341 = vector.load %arg9[%c0_144, %c0_145, %c0_146] : memref<1x8x32xf32, #tpu.memory_space<vmem>>, vector<1x8x32xf32>
      %342 = vector.shape_cast %341 : vector<1x8x32xf32> to vector<8x32xf32>
      %343 = vector.shape_cast %340 : vector<8x32xf32> to vector<1x8x32xf32>
      tpu.vector_store %arg9[%c0_144, %c0_145, %c0_146], %343 {strides = array<i32>} : memref<1x8x32xf32, #tpu.memory_space<vmem>>, vector<1x8x32xf32>,
      %c0_147 = arith.constant 0 : index
      %c0_148 = arith.constant 0 : index
      %c0_149 = arith.constant 0 : index
      %344 = vector.load %arg7[%c0_147, %c0_148, %c0_149] : memref<1x8x32xf32, #tpu.memory_space<vmem>>, vector<1x8x32xf32>
      %345 = vector.shape_cast %344 : vector<1x8x32xf32> to vector<8x32xf32>
      %c0_150 = arith.constant 0 : index
      %c0_151 = arith.constant 0 : index
      %c0_152 = arith.constant 0 : index
      %346 = vector.load %arg10[%c0_150, %c0_151, %c0_152] : memref<1x8x32xf32, #tpu.memory_space<vmem>>, vector<1x8x32xf32>
      %347 = vector.shape_cast %346 : vector<1x8x32xf32> to vector<8x32xf32>
      %348 = vector.shape_cast %345 : vector<8x32xf32> to vector<1x8x32xf32>
      tpu.vector_store %arg10[%c0_150, %c0_151, %c0_152], %348 {strides = array<i32>} : memref<1x8x32xf32, #tpu.memory_space<vmem>>, vector<1x8x32xf32>,
    } else {
    }
    %c0 = arith.constant 0 : index
    %c0_1 = arith.constant 0 : index
    %c0_2 = arith.constant 0 : index
    %3 = vector.load %arg3[%c0, %c0_1, %c0_2] : memref<1x128x128xbf16, #tpu.memory_space<vmem>>, vector<1x128x128xbf16>
    %4 = vector.shape_cast %3 : vector<1x128x128xbf16> to vector<128x128xbf16>
    %c0_3 = arith.constant 0 : index
    %c0_4 = arith.constant 0 : index
    %c0_5 = arith.constant 0 : index
    %5 = vector.load %arg4[%c0_3, %c0_4, %c0_5] : memref<1x32x128xbf16, #tpu.memory_space<vmem>>, vector<1x32x128xbf16>
    %6 = vector.shape_cast %5 : vector<1x32x128xbf16> to vector<32x128xbf16>
    %c0_6 = arith.constant 0 : index
    %c0_7 = arith.constant 0 : index
    %c0_8 = arith.constant 0 : index
    %7 = vector.load %arg5[%c0_6, %c0_7, %c0_8] : memref<1x1x128xf32, #tpu.memory_space<vmem>>, vector<1x1x128xf32>
    %8 = vector.shape_cast %7 : vector<1x1x128xf32> to vector<1x128xf32>
    %c0_9 = arith.constant 0 : index
    %c0_10 = arith.constant 0 : index
    %c0_11 = arith.constant 0 : index
    %9 = vector.load %arg9[%c0_9, %c0_10, %c0_11] : memref<1x8x32xf32, #tpu.memory_space<vmem>>, vector<1x8x32xf32>
    %10 = vector.shape_cast %9 : vector<1x8x32xf32> to vector<8x32xf32>
    %c0_12 = arith.constant 0 : index
    %c0_13 = arith.constant 0 : index
    %c0_14 = arith.constant 0 : index
    %11 = vector.load %arg10[%c0_12, %c0_13, %c0_14] : memref<1x8x32xf32, #tpu.memory_space<vmem>>, vector<1x8x32xf32>
    %12 = vector.shape_cast %11 : vector<1x8x32xf32> to vector<8x32xf32>
    %c0_i32_15 = arith.constant 0 : i32
    %c2_i32 = arith.constant 2 : i32
    %13 = arith.muli %c2_i32, %c0_i32_15 : i32
    %c7_i32 = arith.constant 7 : i32
    %14 = arith.subi %c7_i32, %13 : i32
    %15 = arith.muli %arg0, %14 : i32
    %16 = arith.addi %c0_i32_15, %15 : i32
    %17 = arith.index_cast %16 : i32 to index
    %c0_16 = arith.constant 0 : index
    %c0_17 = arith.constant 0 : index
    %18 = vector.load %arg2[%17, %c0_16, %c0_17] : memref<8x8x128xbf16, #tpu.memory_space<vmem>>, vector<1x8x128xbf16>
    %19 = vector.shape_cast %18 : vector<1x8x128xbf16> to vector<8x128xbf16>
    %cst = arith.constant dense<0.000000e+00> : vector<8x128xf32>
    %20 = tpu.matmul %19, %4, %cst {dimension_numbers = #tpu.dot_dimension_numbers<[1], [0], [0], [1], [0, 0, 1, 1], [], []>} : vector<8x128xbf16>, vector<128x128xbf16>, vector<8x128xf32> -> vector<8x128xf32>
    %21 = arith.truncf %10 : vector<8x32xf32> to vector<8x32xbf16>
    %cst_18 = arith.constant dense<0.000000e+00> : vector<8x128xf32>
    %22 = tpu.matmul %21, %6, %cst_18 {dimension_numbers = #tpu.dot_dimension_numbers<[1], [0], [0], [1], [0, 0, 1, 1], [], []>} : vector<8x32xbf16>, vector<32x128xbf16>, vector<8x128xf32> -> vector<8x128xf32>
    %23 = arith.addf %20, %22 : vector<8x128xf32>
    %24 = vector.broadcast %8 : vector<1x128xf32> to vector<8x128xf32>
    %25 = arith.addf %23, %24 : vector<8x128xf32>
    %26 = math.tanh %25 : vector<8x128xf32>
    %27 = vector.extract_strided_slice %26 {offsets = [0, 0], sizes = [8, 32], strides = [1, 1]} : vector<8x128xf32> to vector<8x32xf32>
    %cst_19 = arith.constant 5.000000e-01 : f32
    %28 = vector.broadcast %cst_19 : f32 to vector<8x32xf32>
    %29 = arith.mulf %28, %27 : vector<8x32xf32>
    %cst_20 = arith.constant 5.000000e-01 : f32
    %30 = vector.broadcast %cst_20 : f32 to vector<8x32xf32>
    %31 = arith.addf %29, %30 : vector<8x32xf32>
    %32 = vector.extract_strided_slice %26 {offsets = [0, 32], sizes = [8, 32], strides = [1, 1]} : vector<8x128xf32> to vector<8x32xf32>
    %cst_21 = arith.constant 5.000000e-01 : f32
    %33 = vector.broadcast %cst_21 : f32 to vector<8x32xf32>
    %34 = arith.mulf %33, %32 : vector<8x32xf32>
    %cst_22 = arith.constant 5.000000e-01 : f32
    %35 = vector.broadcast %cst_22 : f32 to vector<8x32xf32>
    %36 = arith.addf %34, %35 : vector<8x32xf32>
    %37 = vector.extract_strided_slice %26 {offsets = [0, 64], sizes = [8, 32], strides = [1, 1]} : vector<8x128xf32> to vector<8x32xf32>
    %38 = vector.extract_strided_slice %26 {offsets = [0, 96], sizes = [8, 32], strides = [1, 1]} : vector<8x128xf32> to vector<8x32xf32>
    %cst_23 = arith.constant 5.000000e-01 : f32
    %39 = vector.broadcast %cst_23 : f32 to vector<8x32xf32>
    %40 = arith.mulf %39, %38 : vector<8x32xf32>
    %cst_24 = arith.constant 5.000000e-01 : f32
    %41 = vector.broadcast %cst_24 : f32 to vector<8x32xf32>
    %42 = arith.addf %40, %41 : vector<8x32xf32>
    %43 = arith.mulf %36, %12 : vector<8x32xf32>
    %44 = arith.mulf %31, %37 : vector<8x32xf32>
    %45 = arith.addf %43, %44 : vector<8x32xf32>
    %46 = math.tanh %45 : vector<8x32xf32>
    %47 = arith.mulf %42, %46 : vector<8x32xf32>
    %48 = arith.truncf %47 : vector<8x32xf32> to vector<8x32xbf16>
    %c0_25 = arith.constant 0 : index
    %49 = arith.index_cast %16 : i32 to index
    %c0_26 = arith.constant 0 : index
    %c0_27 = arith.constant 0 : index
    %50 = vector.load %arg8[%c0_25, %49, %c0_26, %c0_27] : memref<1x8x8x32xbf16, #tpu.memory_space<vmem>>, vector<1x1x8x32xbf16>
    %51 = vector.shape_cast %50 : vector<1x1x8x32xbf16> to vector<8x32xbf16>
    %52 = vector.shape_cast %48 : vector<8x32xbf16> to vector<1x1x8x32xbf16>
    tpu.vector_store %arg8[%c0_25, %49, %c0_26, %c0_27], %52 {strides = array<i32>} : memref<1x8x8x32xbf16, #tpu.memory_space<vmem>>, vector<1x1x8x32xbf16>,
    %c1_i32 = arith.constant 1 : i32
    %c2_i32_28 = arith.constant 2 : i32
    %53 = arith.muli %c2_i32_28, %c1_i32 : i32
    %c7_i32_29 = arith.constant 7 : i32
    %54 = arith.subi %c7_i32_29, %53 : i32
    %55 = arith.muli %arg0, %54 : i32
    %56 = arith.addi %c1_i32, %55 : i32
    %57 = arith.index_cast %56 : i32 to index
    %c0_30 = arith.constant 0 : index
    %c0_31 = arith.constant 0 : index
    %58 = vector.load %arg2[%57, %c0_30, %c0_31] : memref<8x8x128xbf16, #tpu.memory_space<vmem>>, vector<1x8x128xbf16>
    %59 = vector.shape_cast %58 : vector<1x8x128xbf16> to vector<8x128xbf16>
    %cst_32 = arith.constant dense<0.000000e+00> : vector<8x128xf32>
    %60 = tpu.matmul %59, %4, %cst_32 {dimension_numbers = #tpu.dot_dimension_numbers<[1], [0], [0], [1], [0, 0, 1, 1], [], []>} : vector<8x128xbf16>, vector<128x128xbf16>, vector<8x128xf32> -> vector<8x128xf32>
    %61 = arith.truncf %47 : vector<8x32xf32> to vector<8x32xbf16>
    %cst_33 = arith.constant dense<0.000000e+00> : vector<8x128xf32>
    %62 = tpu.matmul %61, %6, %cst_33 {dimension_numbers = #tpu.dot_dimension_numbers<[1], [0], [0], [1], [0, 0, 1, 1], [], []>} : vector<8x32xbf16>, vector<32x128xbf16>, vector<8x128xf32> -> vector<8x128xf32>
    %63 = arith.addf %60, %62 : vector<8x128xf32>
    %64 = vector.broadcast %8 : vector<1x128xf32> to vector<8x128xf32>
    %65 = arith.addf %63, %64 : vector<8x128xf32>
    %66 = math.tanh %65 : vector<8x128xf32>
    %67 = vector.extract_strided_slice %66 {offsets = [0, 0], sizes = [8, 32], strides = [1, 1]} : vector<8x128xf32> to vector<8x32xf32>
    %cst_34 = arith.constant 5.000000e-01 : f32
    %68 = vector.broadcast %cst_34 : f32 to vector<8x32xf32>
    %69 = arith.mulf %68, %67 : vector<8x32xf32>
    %cst_35 = arith.constant 5.000000e-01 : f32
    %70 = vector.broadcast %cst_35 : f32 to vector<8x32xf32>
    %71 = arith.addf %69, %70 : vector<8x32xf32>
    %72 = vector.extract_strided_slice %66 {offsets = [0, 32], sizes = [8, 32], strides = [1, 1]} : vector<8x128xf32> to vector<8x32xf32>
    %cst_36 = arith.constant 5.000000e-01 : f32
    %73 = vector.broadcast %cst_36 : f32 to vector<8x32xf32>
    %74 = arith.mulf %73, %72 : vector<8x32xf32>
    %cst_37 = arith.constant 5.000000e-01 : f32
    %75 = vector.broadcast %cst_37 : f32 to vector<8x32xf32>
    %76 = arith.addf %74, %75 : vector<8x32xf32>
    %77 = vector.extract_strided_slice %66 {offsets = [0, 64], sizes = [8, 32], strides = [1, 1]} : vector<8x128xf32> to vector<8x32xf32>
    %78 = vector.extract_strided_slice %66 {offsets = [0, 96], sizes = [8, 32], strides = [1, 1]} : vector<8x128xf32> to vector<8x32xf32>
    %cst_38 = arith.constant 5.000000e-01 : f32
    %79 = vector.broadcast %cst_38 : f32 to vector<8x32xf32>
    %80 = arith.mulf %79, %78 : vector<8x32xf32>
    %cst_39 = arith.constant 5.000000e-01 : f32
    %81 = vector.broadcast %cst_39 : f32 to vector<8x32xf32>
    %82 = arith.addf %80, %81 : vector<8x32xf32>
    %83 = arith.mulf %76, %45 : vector<8x32xf32>
    %84 = arith.mulf %71, %77 : vector<8x32xf32>
    %85 = arith.addf %83, %84 : vector<8x32xf32>
    %86 = math.tanh %85 : vector<8x32xf32>
    %87 = arith.mulf %82, %86 : vector<8x32xf32>
    %88 = arith.truncf %87 : vector<8x32xf32> to vector<8x32xbf16>
    %c0_40 = arith.constant 0 : index
    %89 = arith.index_cast %56 : i32 to index
    %c0_41 = arith.constant 0 : index
    %c0_42 = arith.constant 0 : index
    %90 = vector.load %arg8[%c0_40, %89, %c0_41, %c0_42] : memref<1x8x8x32xbf16, #tpu.memory_space<vmem>>, vector<1x1x8x32xbf16>
    %91 = vector.shape_cast %90 : vector<1x1x8x32xbf16> to vector<8x32xbf16>
    %92 = vector.shape_cast %88 : vector<8x32xbf16> to vector<1x1x8x32xbf16>
    tpu.vector_store %arg8[%c0_40, %89, %c0_41, %c0_42], %92 {strides = array<i32>} : memref<1x8x8x32xbf16, #tpu.memory_space<vmem>>, vector<1x1x8x32xbf16>,
    %c2_i32_43 = arith.constant 2 : i32
    %c2_i32_44 = arith.constant 2 : i32
    %93 = arith.muli %c2_i32_44, %c2_i32_43 : i32
    %c7_i32_45 = arith.constant 7 : i32
    %94 = arith.subi %c7_i32_45, %93 : i32
    %95 = arith.muli %arg0, %94 : i32
    %96 = arith.addi %c2_i32_43, %95 : i32
    %97 = arith.index_cast %96 : i32 to index
    %c0_46 = arith.constant 0 : index
    %c0_47 = arith.constant 0 : index
    %98 = vector.load %arg2[%97, %c0_46, %c0_47] : memref<8x8x128xbf16, #tpu.memory_space<vmem>>, vector<1x8x128xbf16>
    %99 = vector.shape_cast %98 : vector<1x8x128xbf16> to vector<8x128xbf16>
    %cst_48 = arith.constant dense<0.000000e+00> : vector<8x128xf32>
    %100 = tpu.matmul %99, %4, %cst_48 {dimension_numbers = #tpu.dot_dimension_numbers<[1], [0], [0], [1], [0, 0, 1, 1], [], []>} : vector<8x128xbf16>, vector<128x128xbf16>, vector<8x128xf32> -> vector<8x128xf32>
    %101 = arith.truncf %87 : vector<8x32xf32> to vector<8x32xbf16>
    %cst_49 = arith.constant dense<0.000000e+00> : vector<8x128xf32>
    %102 = tpu.matmul %101, %6, %cst_49 {dimension_numbers = #tpu.dot_dimension_numbers<[1], [0], [0], [1], [0, 0, 1, 1], [], []>} : vector<8x32xbf16>, vector<32x128xbf16>, vector<8x128xf32> -> vector<8x128xf32>
    %103 = arith.addf %100, %102 : vector<8x128xf32>
    %104 = vector.broadcast %8 : vector<1x128xf32> to vector<8x128xf32>
    %105 = arith.addf %103, %104 : vector<8x128xf32>
    %106 = math.tanh %105 : vector<8x128xf32>
    %107 = vector.extract_strided_slice %106 {offsets = [0, 0], sizes = [8, 32], strides = [1, 1]} : vector<8x128xf32> to vector<8x32xf32>
    %cst_50 = arith.constant 5.000000e-01 : f32
    %108 = vector.broadcast %cst_50 : f32 to vector<8x32xf32>
    %109 = arith.mulf %108, %107 : vector<8x32xf32>
    %cst_51 = arith.constant 5.000000e-01 : f32
    %110 = vector.broadcast %cst_51 : f32 to vector<8x32xf32>
    %111 = arith.addf %109, %110 : vector<8x32xf32>
    %112 = vector.extract_strided_slice %106 {offsets = [0, 32], sizes = [8, 32], strides = [1, 1]} : vector<8x128xf32> to vector<8x32xf32>
    %cst_52 = arith.constant 5.000000e-01 : f32
    %113 = vector.broadcast %cst_52 : f32 to vector<8x32xf32>
    %114 = arith.mulf %113, %112 : vector<8x32xf32>
    %cst_53 = arith.constant 5.000000e-01 : f32
    %115 = vector.broadcast %cst_53 : f32 to vector<8x32xf32>
    %116 = arith.addf %114, %115 : vector<8x32xf32>
    %117 = vector.extract_strided_slice %106 {offsets = [0, 64], sizes = [8, 32], strides = [1, 1]} : vector<8x128xf32> to vector<8x32xf32>
    %118 = vector.extract_strided_slice %106 {offsets = [0, 96], sizes = [8, 32], strides = [1, 1]} : vector<8x128xf32> to vector<8x32xf32>
    %cst_54 = arith.constant 5.000000e-01 : f32
    %119 = vector.broadcast %cst_54 : f32 to vector<8x32xf32>
    %120 = arith.mulf %119, %118 : vector<8x32xf32>
    %cst_55 = arith.constant 5.000000e-01 : f32
    %121 = vector.broadcast %cst_55 : f32 to vector<8x32xf32>
    %122 = arith.addf %120, %121 : vector<8x32xf32>
    %123 = arith.mulf %116, %85 : vector<8x32xf32>
    %124 = arith.mulf %111, %117 : vector<8x32xf32>
    %125 = arith.addf %123, %124 : vector<8x32xf32>
    %126 = math.tanh %125 : vector<8x32xf32>
    %127 = arith.mulf %122, %126 : vector<8x32xf32>
    %128 = arith.truncf %127 : vector<8x32xf32> to vector<8x32xbf16>
    %c0_56 = arith.constant 0 : index
    %129 = arith.index_cast %96 : i32 to index
    %c0_57 = arith.constant 0 : index
    %c0_58 = arith.constant 0 : index
    %130 = vector.load %arg8[%c0_56, %129, %c0_57, %c0_58] : memref<1x8x8x32xbf16, #tpu.memory_space<vmem>>, vector<1x1x8x32xbf16>
    %131 = vector.shape_cast %130 : vector<1x1x8x32xbf16> to vector<8x32xbf16>
    %132 = vector.shape_cast %128 : vector<8x32xbf16> to vector<1x1x8x32xbf16>
    tpu.vector_store %arg8[%c0_56, %129, %c0_57, %c0_58], %132 {strides = array<i32>} : memref<1x8x8x32xbf16, #tpu.memory_space<vmem>>, vector<1x1x8x32xbf16>,
    %c3_i32 = arith.constant 3 : i32
    %c2_i32_59 = arith.constant 2 : i32
    %133 = arith.muli %c2_i32_59, %c3_i32 : i32
    %c7_i32_60 = arith.constant 7 : i32
    %134 = arith.subi %c7_i32_60, %133 : i32
    %135 = arith.muli %arg0, %134 : i32
    %136 = arith.addi %c3_i32, %135 : i32
    %137 = arith.index_cast %136 : i32 to index
    %c0_61 = arith.constant 0 : index
    %c0_62 = arith.constant 0 : index
    %138 = vector.load %arg2[%137, %c0_61, %c0_62] : memref<8x8x128xbf16, #tpu.memory_space<vmem>>, vector<1x8x128xbf16>
    %139 = vector.shape_cast %138 : vector<1x8x128xbf16> to vector<8x128xbf16>
    %cst_63 = arith.constant dense<0.000000e+00> : vector<8x128xf32>
    %140 = tpu.matmul %139, %4, %cst_63 {dimension_numbers = #tpu.dot_dimension_numbers<[1], [0], [0], [1], [0, 0, 1, 1], [], []>} : vector<8x128xbf16>, vector<128x128xbf16>, vector<8x128xf32> -> vector<8x128xf32>
    %141 = arith.truncf %127 : vector<8x32xf32> to vector<8x32xbf16>
    %cst_64 = arith.constant dense<0.000000e+00> : vector<8x128xf32>
    %142 = tpu.matmul %141, %6, %cst_64 {dimension_numbers = #tpu.dot_dimension_numbers<[1], [0], [0], [1], [0, 0, 1, 1], [], []>} : vector<8x32xbf16>, vector<32x128xbf16>, vector<8x128xf32> -> vector<8x128xf32>
    %143 = arith.addf %140, %142 : vector<8x128xf32>
    %144 = vector.broadcast %8 : vector<1x128xf32> to vector<8x128xf32>
    %145 = arith.addf %143, %144 : vector<8x128xf32>
    %146 = math.tanh %145 : vector<8x128xf32>
    %147 = vector.extract_strided_slice %146 {offsets = [0, 0], sizes = [8, 32], strides = [1, 1]} : vector<8x128xf32> to vector<8x32xf32>
    %cst_65 = arith.constant 5.000000e-01 : f32
    %148 = vector.broadcast %cst_65 : f32 to vector<8x32xf32>
    %149 = arith.mulf %148, %147 : vector<8x32xf32>
    %cst_66 = arith.constant 5.000000e-01 : f32
    %150 = vector.broadcast %cst_66 : f32 to vector<8x32xf32>
    %151 = arith.addf %149, %150 : vector<8x32xf32>
    %152 = vector.extract_strided_slice %146 {offsets = [0, 32], sizes = [8, 32], strides = [1, 1]} : vector<8x128xf32> to vector<8x32xf32>
    %cst_67 = arith.constant 5.000000e-01 : f32
    %153 = vector.broadcast %cst_67 : f32 to vector<8x32xf32>
    %154 = arith.mulf %153, %152 : vector<8x32xf32>
    %cst_68 = arith.constant 5.000000e-01 : f32
    %155 = vector.broadcast %cst_68 : f32 to vector<8x32xf32>
    %156 = arith.addf %154, %155 : vector<8x32xf32>
    %157 = vector.extract_strided_slice %146 {offsets = [0, 64], sizes = [8, 32], strides = [1, 1]} : vector<8x128xf32> to vector<8x32xf32>
    %158 = vector.extract_strided_slice %146 {offsets = [0, 96], sizes = [8, 32], strides = [1, 1]} : vector<8x128xf32> to vector<8x32xf32>
    %cst_69 = arith.constant 5.000000e-01 : f32
    %159 = vector.broadcast %cst_69 : f32 to vector<8x32xf32>
    %160 = arith.mulf %159, %158 : vector<8x32xf32>
    %cst_70 = arith.constant 5.000000e-01 : f32
    %161 = vector.broadcast %cst_70 : f32 to vector<8x32xf32>
    %162 = arith.addf %160, %161 : vector<8x32xf32>
    %163 = arith.mulf %156, %125 : vector<8x32xf32>
    %164 = arith.mulf %151, %157 : vector<8x32xf32>
    %165 = arith.addf %163, %164 : vector<8x32xf32>
    %166 = math.tanh %165 : vector<8x32xf32>
    %167 = arith.mulf %162, %166 : vector<8x32xf32>
    %168 = arith.truncf %167 : vector<8x32xf32> to vector<8x32xbf16>
    %c0_71 = arith.constant 0 : index
    %169 = arith.index_cast %136 : i32 to index
    %c0_72 = arith.constant 0 : index
    %c0_73 = arith.constant 0 : index
    %170 = vector.load %arg8[%c0_71, %169, %c0_72, %c0_73] : memref<1x8x8x32xbf16, #tpu.memory_space<vmem>>, vector<1x1x8x32xbf16>
    %171 = vector.shape_cast %170 : vector<1x1x8x32xbf16> to vector<8x32xbf16>
    %172 = vector.shape_cast %168 : vector<8x32xbf16> to vector<1x1x8x32xbf16>
    tpu.vector_store %arg8[%c0_71, %169, %c0_72, %c0_73], %172 {strides = array<i32>} : memref<1x8x8x32xbf16, #tpu.memory_space<vmem>>, vector<1x1x8x32xbf16>,
    %c4_i32 = arith.constant 4 : i32
    %c2_i32_74 = arith.constant 2 : i32
    %173 = arith.muli %c2_i32_74, %c4_i32 : i32
    %c7_i32_75 = arith.constant 7 : i32
    %174 = arith.subi %c7_i32_75, %173 : i32
    %175 = arith.muli %arg0, %174 : i32
    %176 = arith.addi %c4_i32, %175 : i32
    %177 = arith.index_cast %176 : i32 to index
    %c0_76 = arith.constant 0 : index
    %c0_77 = arith.constant 0 : index
    %178 = vector.load %arg2[%177, %c0_76, %c0_77] : memref<8x8x128xbf16, #tpu.memory_space<vmem>>, vector<1x8x128xbf16>
    %179 = vector.shape_cast %178 : vector<1x8x128xbf16> to vector<8x128xbf16>
    %cst_78 = arith.constant dense<0.000000e+00> : vector<8x128xf32>
    %180 = tpu.matmul %179, %4, %cst_78 {dimension_numbers = #tpu.dot_dimension_numbers<[1], [0], [0], [1], [0, 0, 1, 1], [], []>} : vector<8x128xbf16>, vector<128x128xbf16>, vector<8x128xf32> -> vector<8x128xf32>
    %181 = arith.truncf %167 : vector<8x32xf32> to vector<8x32xbf16>
    %cst_79 = arith.constant dense<0.000000e+00> : vector<8x128xf32>
    %182 = tpu.matmul %181, %6, %cst_79 {dimension_numbers = #tpu.dot_dimension_numbers<[1], [0], [0], [1], [0, 0, 1, 1], [], []>} : vector<8x32xbf16>, vector<32x128xbf16>, vector<8x128xf32> -> vector<8x128xf32>
    %183 = arith.addf %180, %182 : vector<8x128xf32>
    %184 = vector.broadcast %8 : vector<1x128xf32> to vector<8x128xf32>
    %185 = arith.addf %183, %184 : vector<8x128xf32>
    %186 = math.tanh %185 : vector<8x128xf32>
    %187 = vector.extract_strided_slice %186 {offsets = [0, 0], sizes = [8, 32], strides = [1, 1]} : vector<8x128xf32> to vector<8x32xf32>
    %cst_80 = arith.constant 5.000000e-01 : f32
    %188 = vector.broadcast %cst_80 : f32 to vector<8x32xf32>
    %189 = arith.mulf %188, %187 : vector<8x32xf32>
    %cst_81 = arith.constant 5.000000e-01 : f32
    %190 = vector.broadcast %cst_81 : f32 to vector<8x32xf32>
    %191 = arith.addf %189, %190 : vector<8x32xf32>
    %192 = vector.extract_strided_slice %186 {offsets = [0, 32], sizes = [8, 32], strides = [1, 1]} : vector<8x128xf32> to vector<8x32xf32>
    %cst_82 = arith.constant 5.000000e-01 : f32
    %193 = vector.broadcast %cst_82 : f32 to vector<8x32xf32>
    %194 = arith.mulf %193, %192 : vector<8x32xf32>
    %cst_83 = arith.constant 5.000000e-01 : f32
    %195 = vector.broadcast %cst_83 : f32 to vector<8x32xf32>
    %196 = arith.addf %194, %195 : vector<8x32xf32>
    %197 = vector.extract_strided_slice %186 {offsets = [0, 64], sizes = [8, 32], strides = [1, 1]} : vector<8x128xf32> to vector<8x32xf32>
    %198 = vector.extract_strided_slice %186 {offsets = [0, 96], sizes = [8, 32], strides = [1, 1]} : vector<8x128xf32> to vector<8x32xf32>
    %cst_84 = arith.constant 5.000000e-01 : f32
    %199 = vector.broadcast %cst_84 : f32 to vector<8x32xf32>
    %200 = arith.mulf %199, %198 : vector<8x32xf32>
    %cst_85 = arith.constant 5.000000e-01 : f32
    %201 = vector.broadcast %cst_85 : f32 to vector<8x32xf32>
    %202 = arith.addf %200, %201 : vector<8x32xf32>
    %203 = arith.mulf %196, %165 : vector<8x32xf32>
    %204 = arith.mulf %191, %197 : vector<8x32xf32>
    %205 = arith.addf %203, %204 : vector<8x32xf32>
    %206 = math.tanh %205 : vector<8x32xf32>
    %207 = arith.mulf %202, %206 : vector<8x32xf32>
    %208 = arith.truncf %207 : vector<8x32xf32> to vector<8x32xbf16>
    %c0_86 = arith.constant 0 : index
    %209 = arith.index_cast %176 : i32 to index
    %c0_87 = arith.constant 0 : index
    %c0_88 = arith.constant 0 : index
    %210 = vector.load %arg8[%c0_86, %209, %c0_87, %c0_88] : memref<1x8x8x32xbf16, #tpu.memory_space<vmem>>, vector<1x1x8x32xbf16>
    %211 = vector.shape_cast %210 : vector<1x1x8x32xbf16> to vector<8x32xbf16>
    %212 = vector.shape_cast %208 : vector<8x32xbf16> to vector<1x1x8x32xbf16>
    tpu.vector_store %arg8[%c0_86, %209, %c0_87, %c0_88], %212 {strides = array<i32>} : memref<1x8x8x32xbf16, #tpu.memory_space<vmem>>, vector<1x1x8x32xbf16>,
    %c5_i32 = arith.constant 5 : i32
    %c2_i32_89 = arith.constant 2 : i32
    %213 = arith.muli %c2_i32_89, %c5_i32 : i32
    %c7_i32_90 = arith.constant 7 : i32
    %214 = arith.subi %c7_i32_90, %213 : i32
    %215 = arith.muli %arg0, %214 : i32
    %216 = arith.addi %c5_i32, %215 : i32
    %217 = arith.index_cast %216 : i32 to index
    %c0_91 = arith.constant 0 : index
    %c0_92 = arith.constant 0 : index
    %218 = vector.load %arg2[%217, %c0_91, %c0_92] : memref<8x8x128xbf16, #tpu.memory_space<vmem>>, vector<1x8x128xbf16>
    %219 = vector.shape_cast %218 : vector<1x8x128xbf16> to vector<8x128xbf16>
    %cst_93 = arith.constant dense<0.000000e+00> : vector<8x128xf32>
    %220 = tpu.matmul %219, %4, %cst_93 {dimension_numbers = #tpu.dot_dimension_numbers<[1], [0], [0], [1], [0, 0, 1, 1], [], []>} : vector<8x128xbf16>, vector<128x128xbf16>, vector<8x128xf32> -> vector<8x128xf32>
    %221 = arith.truncf %207 : vector<8x32xf32> to vector<8x32xbf16>
    %cst_94 = arith.constant dense<0.000000e+00> : vector<8x128xf32>
    %222 = tpu.matmul %221, %6, %cst_94 {dimension_numbers = #tpu.dot_dimension_numbers<[1], [0], [0], [1], [0, 0, 1, 1], [], []>} : vector<8x32xbf16>, vector<32x128xbf16>, vector<8x128xf32> -> vector<8x128xf32>
    %223 = arith.addf %220, %222 : vector<8x128xf32>
    %224 = vector.broadcast %8 : vector<1x128xf32> to vector<8x128xf32>
    %225 = arith.addf %223, %224 : vector<8x128xf32>
    %226 = math.tanh %225 : vector<8x128xf32>
    %227 = vector.extract_strided_slice %226 {offsets = [0, 0], sizes = [8, 32], strides = [1, 1]} : vector<8x128xf32> to vector<8x32xf32>
    %cst_95 = arith.constant 5.000000e-01 : f32
    %228 = vector.broadcast %cst_95 : f32 to vector<8x32xf32>
    %229 = arith.mulf %228, %227 : vector<8x32xf32>
    %cst_96 = arith.constant 5.000000e-01 : f32
    %230 = vector.broadcast %cst_96 : f32 to vector<8x32xf32>
    %231 = arith.addf %229, %230 : vector<8x32xf32>
    %232 = vector.extract_strided_slice %226 {offsets = [0, 32], sizes = [8, 32], strides = [1, 1]} : vector<8x128xf32> to vector<8x32xf32>
    %cst_97 = arith.constant 5.000000e-01 : f32
    %233 = vector.broadcast %cst_97 : f32 to vector<8x32xf32>
    %234 = arith.mulf %233, %232 : vector<8x32xf32>
    %cst_98 = arith.constant 5.000000e-01 : f32
    %235 = vector.broadcast %cst_98 : f32 to vector<8x32xf32>
    %236 = arith.addf %234, %235 : vector<8x32xf32>
    %237 = vector.extract_strided_slice %226 {offsets = [0, 64], sizes = [8, 32], strides = [1, 1]} : vector<8x128xf32> to vector<8x32xf32>
    %238 = vector.extract_strided_slice %226 {offsets = [0, 96], sizes = [8, 32], strides = [1, 1]} : vector<8x128xf32> to vector<8x32xf32>
    %cst_99 = arith.constant 5.000000e-01 : f32
    %239 = vector.broadcast %cst_99 : f32 to vector<8x32xf32>
    %240 = arith.mulf %239, %238 : vector<8x32xf32>
    %cst_100 = arith.constant 5.000000e-01 : f32
    %241 = vector.broadcast %cst_100 : f32 to vector<8x32xf32>
    %242 = arith.addf %240, %241 : vector<8x32xf32>
    %243 = arith.mulf %236, %205 : vector<8x32xf32>
    %244 = arith.mulf %231, %237 : vector<8x32xf32>
    %245 = arith.addf %243, %244 : vector<8x32xf32>
    %246 = math.tanh %245 : vector<8x32xf32>
    %247 = arith.mulf %242, %246 : vector<8x32xf32>
    %248 = arith.truncf %247 : vector<8x32xf32> to vector<8x32xbf16>
    %c0_101 = arith.constant 0 : index
    %249 = arith.index_cast %216 : i32 to index
    %c0_102 = arith.constant 0 : index
    %c0_103 = arith.constant 0 : index
    %250 = vector.load %arg8[%c0_101, %249, %c0_102, %c0_103] : memref<1x8x8x32xbf16, #tpu.memory_space<vmem>>, vector<1x1x8x32xbf16>
    %251 = vector.shape_cast %250 : vector<1x1x8x32xbf16> to vector<8x32xbf16>
    %252 = vector.shape_cast %248 : vector<8x32xbf16> to vector<1x1x8x32xbf16>
    tpu.vector_store %arg8[%c0_101, %249, %c0_102, %c0_103], %252 {strides = array<i32>} : memref<1x8x8x32xbf16, #tpu.memory_space<vmem>>, vector<1x1x8x32xbf16>,
    %c6_i32 = arith.constant 6 : i32
    %c2_i32_104 = arith.constant 2 : i32
    %253 = arith.muli %c2_i32_104, %c6_i32 : i32
    %c7_i32_105 = arith.constant 7 : i32
    %254 = arith.subi %c7_i32_105, %253 : i32
    %255 = arith.muli %arg0, %254 : i32
    %256 = arith.addi %c6_i32, %255 : i32
    %257 = arith.index_cast %256 : i32 to index
    %c0_106 = arith.constant 0 : index
    %c0_107 = arith.constant 0 : index
    %258 = vector.load %arg2[%257, %c0_106, %c0_107] : memref<8x8x128xbf16, #tpu.memory_space<vmem>>, vector<1x8x128xbf16>
    %259 = vector.shape_cast %258 : vector<1x8x128xbf16> to vector<8x128xbf16>
    %cst_108 = arith.constant dense<0.000000e+00> : vector<8x128xf32>
    %260 = tpu.matmul %259, %4, %cst_108 {dimension_numbers = #tpu.dot_dimension_numbers<[1], [0], [0], [1], [0, 0, 1, 1], [], []>} : vector<8x128xbf16>, vector<128x128xbf16>, vector<8x128xf32> -> vector<8x128xf32>
    %261 = arith.truncf %247 : vector<8x32xf32> to vector<8x32xbf16>
    %cst_109 = arith.constant dense<0.000000e+00> : vector<8x128xf32>
    %262 = tpu.matmul %261, %6, %cst_109 {dimension_numbers = #tpu.dot_dimension_numbers<[1], [0], [0], [1], [0, 0, 1, 1], [], []>} : vector<8x32xbf16>, vector<32x128xbf16>, vector<8x128xf32> -> vector<8x128xf32>
    %263 = arith.addf %260, %262 : vector<8x128xf32>
    %264 = vector.broadcast %8 : vector<1x128xf32> to vector<8x128xf32>
    %265 = arith.addf %263, %264 : vector<8x128xf32>
    %266 = math.tanh %265 : vector<8x128xf32>
    %267 = vector.extract_strided_slice %266 {offsets = [0, 0], sizes = [8, 32], strides = [1, 1]} : vector<8x128xf32> to vector<8x32xf32>
    %cst_110 = arith.constant 5.000000e-01 : f32
    %268 = vector.broadcast %cst_110 : f32 to vector<8x32xf32>
    %269 = arith.mulf %268, %267 : vector<8x32xf32>
    %cst_111 = arith.constant 5.000000e-01 : f32
    %270 = vector.broadcast %cst_111 : f32 to vector<8x32xf32>
    %271 = arith.addf %269, %270 : vector<8x32xf32>
    %272 = vector.extract_strided_slice %266 {offsets = [0, 32], sizes = [8, 32], strides = [1, 1]} : vector<8x128xf32> to vector<8x32xf32>
    %cst_112 = arith.constant 5.000000e-01 : f32
    %273 = vector.broadcast %cst_112 : f32 to vector<8x32xf32>
    %274 = arith.mulf %273, %272 : vector<8x32xf32>
    %cst_113 = arith.constant 5.000000e-01 : f32
    %275 = vector.broadcast %cst_113 : f32 to vector<8x32xf32>
    %276 = arith.addf %274, %275 : vector<8x32xf32>
    %277 = vector.extract_strided_slice %266 {offsets = [0, 64], sizes = [8, 32], strides = [1, 1]} : vector<8x128xf32> to vector<8x32xf32>
    %278 = vector.extract_strided_slice %266 {offsets = [0, 96], sizes = [8, 32], strides = [1, 1]} : vector<8x128xf32> to vector<8x32xf32>
    %cst_114 = arith.constant 5.000000e-01 : f32
    %279 = vector.broadcast %cst_114 : f32 to vector<8x32xf32>
    %280 = arith.mulf %279, %278 : vector<8x32xf32>
    %cst_115 = arith.constant 5.000000e-01 : f32
    %281 = vector.broadcast %cst_115 : f32 to vector<8x32xf32>
    %282 = arith.addf %280, %281 : vector<8x32xf32>
    %283 = arith.mulf %276, %245 : vector<8x32xf32>
    %284 = arith.mulf %271, %277 : vector<8x32xf32>
    %285 = arith.addf %283, %284 : vector<8x32xf32>
    %286 = math.tanh %285 : vector<8x32xf32>
    %287 = arith.mulf %282, %286 : vector<8x32xf32>
    %288 = arith.truncf %287 : vector<8x32xf32> to vector<8x32xbf16>
    %c0_116 = arith.constant 0 : index
    %289 = arith.index_cast %256 : i32 to index
    %c0_117 = arith.constant 0 : index
    %c0_118 = arith.constant 0 : index
    %290 = vector.load %arg8[%c0_116, %289, %c0_117, %c0_118] : memref<1x8x8x32xbf16, #tpu.memory_space<vmem>>, vector<1x1x8x32xbf16>
    %291 = vector.shape_cast %290 : vector<1x1x8x32xbf16> to vector<8x32xbf16>
    %292 = vector.shape_cast %288 : vector<8x32xbf16> to vector<1x1x8x32xbf16>
    tpu.vector_store %arg8[%c0_116, %289, %c0_117, %c0_118], %292 {strides = array<i32>} : memref<1x8x8x32xbf16, #tpu.memory_space<vmem>>, vector<1x1x8x32xbf16>,
    %c7_i32_119 = arith.constant 7 : i32
    %c2_i32_120 = arith.constant 2 : i32
    %293 = arith.muli %c2_i32_120, %c7_i32_119 : i32
    %c7_i32_121 = arith.constant 7 : i32
    %294 = arith.subi %c7_i32_121, %293 : i32
    %295 = arith.muli %arg0, %294 : i32
    %296 = arith.addi %c7_i32_119, %295 : i32
    %297 = arith.index_cast %296 : i32 to index
    %c0_122 = arith.constant 0 : index
    %c0_123 = arith.constant 0 : index
    %298 = vector.load %arg2[%297, %c0_122, %c0_123] : memref<8x8x128xbf16, #tpu.memory_space<vmem>>, vector<1x8x128xbf16>
    %299 = vector.shape_cast %298 : vector<1x8x128xbf16> to vector<8x128xbf16>
    %cst_124 = arith.constant dense<0.000000e+00> : vector<8x128xf32>
    %300 = tpu.matmul %299, %4, %cst_124 {dimension_numbers = #tpu.dot_dimension_numbers<[1], [0], [0], [1], [0, 0, 1, 1], [], []>} : vector<8x128xbf16>, vector<128x128xbf16>, vector<8x128xf32> -> vector<8x128xf32>
    %301 = arith.truncf %287 : vector<8x32xf32> to vector<8x32xbf16>
    %cst_125 = arith.constant dense<0.000000e+00> : vector<8x128xf32>
    %302 = tpu.matmul %301, %6, %cst_125 {dimension_numbers = #tpu.dot_dimension_numbers<[1], [0], [0], [1], [0, 0, 1, 1], [], []>} : vector<8x32xbf16>, vector<32x128xbf16>, vector<8x128xf32> -> vector<8x128xf32>
    %303 = arith.addf %300, %302 : vector<8x128xf32>
    %304 = vector.broadcast %8 : vector<1x128xf32> to vector<8x128xf32>
    %305 = arith.addf %303, %304 : vector<8x128xf32>
    %306 = math.tanh %305 : vector<8x128xf32>
    %307 = vector.extract_strided_slice %306 {offsets = [0, 0], sizes = [8, 32], strides = [1, 1]} : vector<8x128xf32> to vector<8x32xf32>
    %cst_126 = arith.constant 5.000000e-01 : f32
    %308 = vector.broadcast %cst_126 : f32 to vector<8x32xf32>
    %309 = arith.mulf %308, %307 : vector<8x32xf32>
    %cst_127 = arith.constant 5.000000e-01 : f32
    %310 = vector.broadcast %cst_127 : f32 to vector<8x32xf32>
    %311 = arith.addf %309, %310 : vector<8x32xf32>
    %312 = vector.extract_strided_slice %306 {offsets = [0, 32], sizes = [8, 32], strides = [1, 1]} : vector<8x128xf32> to vector<8x32xf32>
    %cst_128 = arith.constant 5.000000e-01 : f32
    %313 = vector.broadcast %cst_128 : f32 to vector<8x32xf32>
    %314 = arith.mulf %313, %312 : vector<8x32xf32>
    %cst_129 = arith.constant 5.000000e-01 : f32
    %315 = vector.broadcast %cst_129 : f32 to vector<8x32xf32>
    %316 = arith.addf %314, %315 : vector<8x32xf32>
    %317 = vector.extract_strided_slice %306 {offsets = [0, 64], sizes = [8, 32], strides = [1, 1]} : vector<8x128xf32> to vector<8x32xf32>
    %318 = vector.extract_strided_slice %306 {offsets = [0, 96], sizes = [8, 32], strides = [1, 1]} : vector<8x128xf32> to vector<8x32xf32>
    %cst_130 = arith.constant 5.000000e-01 : f32
    %319 = vector.broadcast %cst_130 : f32 to vector<8x32xf32>
    %320 = arith.mulf %319, %318 : vector<8x32xf32>
    %cst_131 = arith.constant 5.000000e-01 : f32
    %321 = vector.broadcast %cst_131 : f32 to vector<8x32xf32>
    %322 = arith.addf %320, %321 : vector<8x32xf32>
    %323 = arith.mulf %316, %285 : vector<8x32xf32>
    %324 = arith.mulf %311, %317 : vector<8x32xf32>
    %325 = arith.addf %323, %324 : vector<8x32xf32>
    %326 = math.tanh %325 : vector<8x32xf32>
    %327 = arith.mulf %322, %326 : vector<8x32xf32>
    %328 = arith.truncf %327 : vector<8x32xf32> to vector<8x32xbf16>
    %c0_132 = arith.constant 0 : index
    %329 = arith.index_cast %296 : i32 to index
    %c0_133 = arith.constant 0 : index
    %c0_134 = arith.constant 0 : index
    %330 = vector.load %arg8[%c0_132, %329, %c0_133, %c0_134] : memref<1x8x8x32xbf16, #tpu.memory_space<vmem>>, vector<1x1x8x32xbf16>
    %331 = vector.shape_cast %330 : vector<1x1x8x32xbf16> to vector<8x32xbf16>
    %332 = vector.shape_cast %328 : vector<8x32xbf16> to vector<1x1x8x32xbf16>
    tpu.vector_store %arg8[%c0_132, %329, %c0_133, %c0_134], %332 {strides = array<i32>} : memref<1x8x8x32xbf16, #tpu.memory_space<vmem>>, vector<1x1x8x32xbf16>,
    %c8_i32 = arith.constant 8 : i32
    %c0_135 = arith.constant 0 : index
    %c0_136 = arith.constant 0 : index
    %c0_137 = arith.constant 0 : index
    %333 = vector.load %arg9[%c0_135, %c0_136, %c0_137] : memref<1x8x32xf32, #tpu.memory_space<vmem>>, vector<1x8x32xf32>
    %334 = vector.shape_cast %333 : vector<1x8x32xf32> to vector<8x32xf32>
    %335 = vector.shape_cast %327 : vector<8x32xf32> to vector<1x8x32xf32>
    tpu.vector_store %arg9[%c0_135, %c0_136, %c0_137], %335 {strides = array<i32>} : memref<1x8x32xf32, #tpu.memory_space<vmem>>, vector<1x8x32xf32>,
    %c0_138 = arith.constant 0 : index
    %c0_139 = arith.constant 0 : index
    %c0_140 = arith.constant 0 : index
    %336 = vector.load %arg10[%c0_138, %c0_139, %c0_140] : memref<1x8x32xf32, #tpu.memory_space<vmem>>, vector<1x8x32xf32>
    %337 = vector.shape_cast %336 : vector<1x8x32xf32> to vector<8x32xf32>
    %338 = vector.shape_cast %325 : vector<8x32xf32> to vector<1x8x32xf32>
    tpu.vector_store %arg10[%c0_138, %c0_139, %c0_140], %338 {strides = array<i32>} : memref<1x8x32xf32, #tpu.memory_space<vmem>>, vector<1x8x32xf32>,
    return
  }
  func.func @transform_0(%arg0: i32, %arg1: i32) -> (i32, i32, i32) {
    %c2_i32 = arith.constant 2 : i32
    %0 = arith.muli %c2_i32, %arg1 : i32
    %c0_i32 = arith.constant 0 : i32
    %1 = arith.subi %c0_i32, %0 : i32
    %2 = arith.muli %arg0, %1 : i32
    %3 = arith.addi %arg1, %2 : i32
    %c0_i32_0 = arith.constant 0 : i32
    %c0_i32_1 = arith.constant 0 : i32
    %c0_i32_2 = arith.constant 0 : i32
    return %3, %c0_i32_0, %c0_i32_1 : i32, i32, i32
  }
  func.func @transform_1(%arg0: i32, %arg1: i32) -> (i32, i32, i32) {
    %c0_i32 = arith.constant 0 : i32
    %c0_i32_0 = arith.constant 0 : i32
    %c0_i32_1 = arith.constant 0 : i32
    return %arg0, %c0_i32, %c0_i32_0 : i32, i32, i32
  }
  func.func @transform_2(%arg0: i32, %arg1: i32) -> (i32, i32, i32) {
    %c0_i32 = arith.constant 0 : i32
    %c0_i32_0 = arith.constant 0 : i32
    %c0_i32_1 = arith.constant 0 : i32
    return %arg0, %c0_i32, %c0_i32_0 : i32, i32, i32
  }
  func.func @transform_3(%arg0: i32, %arg1: i32) -> (i32, i32, i32) {
    %c0_i32 = arith.constant 0 : i32
    %c0_i32_0 = arith.constant 0 : i32
    %c0_i32_1 = arith.constant 0 : i32
    return %arg0, %c0_i32, %c0_i32_0 : i32, i32, i32
  }
  func.func @transform_4(%arg0: i32, %arg1: i32) -> (i32, i32, i32) {
    %c0_i32 = arith.constant 0 : i32
    %c0_i32_0 = arith.constant 0 : i32
    %c0_i32_1 = arith.constant 0 : i32
    return %arg0, %c0_i32, %c0_i32_0 : i32, i32, i32
  }
  func.func @transform_5(%arg0: i32, %arg1: i32) -> (i32, i32, i32) {
    %c0_i32 = arith.constant 0 : i32
    %c0_i32_0 = arith.constant 0 : i32
    %c0_i32_1 = arith.constant 0 : i32
    return %arg0, %c0_i32, %c0_i32_0 : i32, i32, i32
  }
  func.func @transform_6(%arg0: i32, %arg1: i32) -> (i32, i32, i32, i32) {
    %c2_i32 = arith.constant 2 : i32
    %0 = arith.muli %c2_i32, %arg1 : i32
    %c0_i32 = arith.constant 0 : i32
    %1 = arith.subi %c0_i32, %0 : i32
    %2 = arith.muli %arg0, %1 : i32
    %3 = arith.addi %arg1, %2 : i32
    %c0_i32_0 = arith.constant 0 : i32
    %c0_i32_1 = arith.constant 0 : i32
    %c0_i32_2 = arith.constant 0 : i32
    return %arg0, %3, %c0_i32_0, %c0_i32_1 : i32, i32, i32, i32
  }
  func.func @transform_7(%arg0: i32, %arg1: i32) -> (i32, i32, i32) {
    %c0_i32 = arith.constant 0 : i32
    %c0_i32_0 = arith.constant 0 : i32
    %c0_i32_1 = arith.constant 0 : i32
    return %arg0, %c0_i32, %c0_i32_0 : i32, i32, i32
  }
  func.func @transform_8(%arg0: i32, %arg1: i32) -> (i32, i32, i32) {
    %c0_i32 = arith.constant 0 : i32
    %c0_i32_0 = arith.constant 0 : i32
    %c0_i32_1 = arith.constant 0 : i32
    return %arg0, %c0_i32, %c0_i32_0 : i32, i32, i32
  }
}

</mosaic_0001>

<bundles_post_ra>
// kernel: lstm_forward.2
= control target key start
LH: loop header
LB: loop body
LE: loop exit
PB: predicated region body
PF: predicated region fallthrough
CT: control target
= control target key end

     0   :  { %s2384_s27 = smov 0   ;;  %s2386_s28 = smov 0   ;;  %s2853_s0 = inlined_call_operand.vmem [shape: bf16[8,8,128], index: 0, kind: input, shape index: {}]   ;;  %s2854_s1 = inlined_call_operand.vmem [shape: bf16[2,128,128], index: 1, kind: input, shape index: {}]   ;;  %s2855_s2 = inlined_call_operand.vmem [shape: bf16[2,32,128], index: 2, kind: input, shape index: {}]   ;;  %s2856_s3 = inlined_call_operand.vmem [shape: f32[2,1,128], index: 3, kind: input, shape index: {}]   ;;  %s2857_s4 = inlined_call_operand.vmem [shape: f32[2,8,32], index: 4, kind: input, shape index: {}, may-alias: {4,5}]   ;;  %s2858_s5 = inlined_call_operand.vmem [shape: f32[2,8,32], index: 5, kind: input, shape index: {}, may-alias: {4,5}]   ;;  %s2859_s6 = inlined_call_operand.vmem [shape: bf16[2,8,8,32], index: 6, kind: output, shape index: {0}]   ;;  %s2860_s7 = inlined_call_operand.vmem [shape: f32[2,8,32], index: 7, kind: output, shape index: {1}]   ;;  %s2861_s8 = inlined_call_operand.vmem [shape: f32[2,8,32], index: 8, kind: output, shape index: {2}]  }
   0x1   :  { %s2388_s29 = smov 0  }
   0x2 LB: > { %s31_s30 = sadd.s32 1, %s2328_s28  ;;  %p1838_p0 = scmp.ge.s32.totalorder %s2332_s29, 1  ;;  %s2332_s29 = sphi %s2388_s29, %s19_s29   ;;  %s2328_s28 = sphi %s2386_s28, %s2863_s28   ;;  %s2324_s27 = sphi %s2384_s27, %s2862_s27  }
   0x3   : > { %p33_p1 = scmp.ge.s32.totalorder %s31_s30, 2  ;;  %p352_p2 = scmp.lt.s32.totalorder %s2332_s29, 3 }
   0x5   : > { %s2865_s30 = smov (%p33_p1, %s31_s30), 0  ;;  %p353_p3 = pnand %p1838_p0, %p352_p2 }
   0x6   : > { %p441_p4 = scmp.lt.s32.totalorder (!%p353_p3), %s2324_s27, 1  ;;  %v2334_v0 = vmov (!%p353_p3), 0.0   ;;  %vm2335_vm0 = vmmov (!%p353_p3), 0   ;;  %vm494_vm1 = vcmask (!%p353_p3), 261120   ;;  %s1909_s25 = smul.u32 (!%p353_p3), 28, %s2324_s27  ;;  %vm710_vm2 = vcmask (!%p353_p3), 257024  }
   0x7   : > { %356 = sbr.rel (%p353_p3) target bundleno = 5940 (0x1734), region = 44  ;;  %2015 = vmatprep.subr.bf16.mxu1 (!%p353_p3), %v2334_v0  ;;  %2019 = vmatprep.mubr.msk.bf16.mxu1 (!%p353_p3), %vm2335_vm0, %v2334_v0  ;;  %s2337_s22 = smov (!%p353_p3), 32  }
   0x8   : > { %2043 = vmatprep.subr.bf16.mxu0 (!%p353_p3), %v2334_v0  ;;  %2047 = vmatprep.mubr.msk.bf16.mxu0 (!%p353_p3), %vm2335_vm0, %v2334_v0  ;;  %s1864_s23 = smul.u32 (!%p353_p3), 20, %s2324_s27  ;;  %s1876_s16 = sshll.u32 (!%p353_p3), %s2324_s27, 2 }
   0x9   : > { %s1870_s12 = smul.u32 (!%p353_p3), 12, %s2324_s27  ;;  %s1074_s26 = ssub.s32 (!%p353_p3), 4, %s2324_s27 }
   0xa   : > { %s1898_s19 = smul.u32 (!%p353_p3), 4294967268, %s2324_s27 }
   0xb   : > { %s1700_s15 = scalar_lea.vmem (!%p353_p3), %s2853_s0, %s1870_s12 }
   0xe   : > { %s2409_s9 = scalar_select %p441_p4, %s2324_s27, 1 }
  0x10   : > { %s1906_s10 = sshll.u32 %s2409_s9, 6  ;;  %s1907_s11 = sshll.u32 %s2409_s9, 4 }
  0x11   : > { %s450_s14 = scalar_lea.vmem %s2855_s2, %s1907_s11  ;;  %s2422_s17 = scalar_lea.vmem %s2854_s1, %s1906_s10 }
  0x12   : > { %v2424_v1 = vld [vmem:[%s450_s14] sm:$0xff]   ;;  %s2427_s18 = sshll.u32 %s2409_s9, 3  ;;  %v2429_v2 = vld [vmem:[%s450_s14 + $0x8] sm:$0xff]   ;;  %v2465_v8 = vld [vmem:[%s2422_s17 + $0x10] sm:$0xff]   ;;  %s523_s11 = scalar_lea.vmem %s2853_s0, %s1909_s25 }
  0x13   : > { %s457_s21 = scalar_lea.vmem %s2857_s4, %s2427_s18  ;;  %s2439_s24 = scalar_lea.vmem %s2860_s7, %s2427_s18  ;;  %2016 = vmatpush3.bf16.msra.mxu1 %v2424_v1  ;;  %2044 = vmatpush3.bf16.msra.mxu0 %v2424_v1  ;;  %v2453_v5 = vld [vmem:[%s2422_s17] sm:$0xff]   ;;  %v2458_v7 = vld [vmem:[%s2422_s17 + $0x8] sm:$0xff]   ;;  %v2470_v9 = vld [vmem:[%s2422_s17 + $0x18] sm:$0xff]  }
  0x14   : > { %v493_v3 = vld [vmem:[%s457_s21] sm:$0xff]  ;;  %2017 = vmatprep.subr.bf16.mxu1 %v2334_v0  ;;  %2045 = vmatprep.subr.bf16.mxu0 %v2334_v0  ;;  %v2480_v11 = vld [vmem:[%s2422_s17 + $0x28] sm:$0xff]   ;;  %v2485_v12 = vld [vmem:[%s2422_s17 + $0x30] sm:$0xff]   ;;  %s461_s14 = scalar_lea.vmem %s2858_s5, %s2427_s18  ;;  %s453_s21 = scalar_lea.vmem %s2856_s3, %s2409_s9 }
  0x15   : > { %495 = vst.msk [vmem:[%s2439_s24] sm:$0xff] %vm494_vm1, %v493_v3  ;;  %v2475_v10 = vld [vmem:[%s2422_s17 + $0x20] sm:$0xff]   ;;  %v2491_v13 = vld [vmem:[%s2422_s17 + $0x38] sm:$0xff]   ;;  %s2515_s17 = scalar_lea.vmem %s2861_s8, %s2427_s18  ;;  %s2336_s18 = smov 64  }
  0x16   : > { %v524_v14 = vld [vmem:[%s523_s11] sm:$0xf]  ;;  %s1692_s11 = scalar_lea.vmem %s2853_s0, %s1864_s23  ;;  %s2668_s10 = sshll.u32 %s1074_s26, 2 }
  0x17   : > { %2018 = vmatpush3.bf16.msra.mxu1 %v2429_v2  ;;  %2046 = vmatpush3.bf16.msra.mxu0 %v2429_v2  ;;  %v496_v15 = vld [vmem:[%s461_s14] sm:$0xff]  ;;  %s1076_s14 = scalar_lea.vmem %s2853_s0, %s2668_s10  ;;  %s1892_s26 = smul.u32 4294967276, %s2324_s27 }
  0x18   : > { %2023 = vmatprep.subr.bf16.mxu1 %v2334_v0  ;;  %2051 = vmatprep.subr.bf16.mxu0 %v2334_v0  ;;  %497 = vst.msk [vmem:[%s2515_s17] sm:$0xff] %vm494_vm1, %v496_v15  ;;  %v2523_v20 = vld [vmem:[%s453_s21] ss:$0 sm:$0xff]  ;;  %v1865_v42 = vld [vmem:[%s1692_s11 + $0x4] sm:$0xf]  ;;  %s1707_s21 = scalar_lea.vmem %s2853_s0, %s1876_s16  ;;  %s1734_s11 = scalar_lea.vmem %s2853_s0, %s1898_s19 }
  0x19   : > { %s1908_s13 = sshll.u32 %s2409_s9, 5 }
  0x1c   : > { %v519_v4 = vld [vmem:[%s2439_s24] sm:$0xff] }
  0x1d   : > { %v525_v6 = vpack.c.bf16 %v519_v4, %v519_v4 }
  0x1f   : > { %2020 = vmatmul.mubr.msk.bf16.vlgmr.msra.gmra.mrb[0].mxu1 %vm494_vm1, %v525_v6  ;;  %v520_v28 = vld [vmem:[%s2515_s17] sm:$0xff]  ;;  %v1871_v6 = vld [vmem:[%s1700_s15 + $0x8] sm:$0xf]  ;;  %s1886_s15 = smul.u32 4294967284, %s2324_s27 }
  0x20   : > { %2024 = vmatpush3.bf16.msra.mxu1 %v2453_v5  ;;  %2039 = vmatprep.mubr.msk.bf16.mxu1 %vm2335_vm0, %v2334_v0 }
  0x21   : > { %2025 = vmatprep.subr.bf16.mxu1 %v2334_v0 }
  0x24   : > { %2026 = vmatpush3.bf16.msra.mxu1 %v2458_v7 }
  0x25   : > { %2027 = vmatprep.subr.bf16.mxu1 %v2334_v0 }
  0x28   : > { %2028 = vmatpush3.bf16.msra.mxu1 %v2465_v8 }
  0x29   : > { %2029 = vmatprep.subr.bf16.mxu1 %v2334_v0 }
  0x2c   : > { %2030 = vmatpush3.bf16.msra.mxu1 %v2470_v9 }
  0x2d   : > { %2031 = vmatprep.subr.bf16.mxu1 %v2334_v0 }
  0x30   : > { %2032 = vmatpush3.bf16.msra.mxu1 %v2475_v10 }
  0x31   : > { %2033 = vmatprep.subr.bf16.mxu1 %v2334_v0 }
  0x34   : > { %2034 = vmatpush3.bf16.msra.mxu1 %v2480_v11 }
  0x35   : > { %2035 = vmatprep.subr.bf16.mxu1 %v2334_v0 }
  0x38   : > { %2036 = vmatpush3.bf16.msra.mxu1 %v2485_v12 }
  0x39   : > { %2037 = vmatprep.subr.bf16.mxu1 %v2334_v0 }
  0x3c   : > { %2038 = vmatpush3.bf16.msra.mxu1 %v2491_v13 }
  0x3d   : > { %2071 = vmatprep.subr.bf16.mxu1 %v2334_v0 }
  0x3f   : > { %2040 = vmatmul.mubr.bf16.vlgmr.msra.gmra.mrb[4].mxu1 %v524_v14 }
  0x40   : > { %2072 = vmatpush3.bf16.msra.mxu1 %v2424_v1  ;;  %2075 = vmatprep.mubr.msk.bf16.mxu1 %vm2335_vm0, %v2334_v0 }
  0x41   : > { %2073 = vmatprep.subr.bf16.mxu1 %v2334_v0 }
  0x44   : > { %2074 = vmatpush3.bf16.msra.mxu1 %v2429_v2 }
  0x45   : > { %2079 = vmatprep.subr.bf16.mxu1 %v2334_v0 }
  0xf2   : > { %v576_v16 = vpop.f32.mrb[0].mxu1 }
  0xf3   : > { %v2021_v17 = vpop.f32.mrb[1].mxu1 }
  0xf4   : > { %v579_v18 = vpop.f32.mrb[2].mxu1 }
  0xf5   : > { %v2022_v19 = vpop.f32.mrb[3].mxu1 }
 0x112   : > { %v664_v21 = vpop.f32.mrb[4].mxu1 }
 0x113   : > { %v665_v22 = vadd.f32 %v664_v21, %v576_v16  ;;  %v2041_v23 = vpop.f32.mrb[5].mxu1 }
 0x114   : > { %v667_v24 = vpop.f32.mrb[6].mxu1 }
 0x115   : > { %v676_v25 = vadd.f32 %v2523_v20, %v665_v22  ;;  %v2042_v26 = vpop.f32.mrb[7].mxu1 }
 0x117   : > { %2278 = vtanh.f32 %v676_v25 }
 0x121   : > { %v2279_v27 = vpop.eup %2278 }
 0x122   : > { %686 = vrot.lane.b32.xlu0 %v2279_v27, %s2336_s18  ;;  %v678_v29 = vmul.f32 0.5, %v2279_v27 }
 0x124   : > { %v679_v30 = vadd.f32 0.5, %v678_v29 }
 0x126   : > { %681 = vrot.lane.b32.xlu0 %v520_v28, %s2337_s22 }
 0x194   : > { %v687_v31 = vpop.permute.xlu0 %686 }
 0x195   : > { %v689_v32 = vmul.f32 %v687_v31, %v679_v30 }
 0x197   : > { %691 = vrot.lane.b32.xlu1 %v689_v32, %s2337_s22 }
 0x198   : > { %v682_v33 = vpop.permute.xlu0 %681 }
 0x199   : > { %v684_v34 = vmul.f32 %v682_v33, %v679_v30 }
 0x209   : > { %v692_v35 = vpop.permute.xlu1 %691 }
 0x20a   : > { %v694_v36 = vadd.f32 %v692_v35, %v684_v34 }
 0x20c   : > { %2280 = vtanh.f32 %v694_v36 }
 0x216   : > { %v2281_v37 = vpop.eup %2280 }
 0x217   : > { %697 = vrot.lane.b32.xlu1 %v2281_v37, %s2336_s18 }
 0x289   : > { %v698_v38 = vpop.permute.xlu1 %697 }
 0x28a   : > { %v700_v39 = vmul.f32 %v698_v38, %v679_v30  ;;  %v1877_v38 = vld [vmem:[%s1707_s21 + $0xc] sm:$0xf]  ;;  %s1718_s21 = scalar_lea.vmem %s2853_s0, %s1886_s15 }
 0x28c   : > { %v2531_v40 = vpack.c.bf16 %v700_v39, %v700_v39 }
 0x28e   : > { %717 = vrot.lane.b32.xlu0 %v2531_v40, %s2337_s22 }
 0x300   : > { %v718_v41 = vpop.permute.xlu0 %717 }
 0x301   : > { %2048 = vmatmul.mubr.msk.bf16.vlgmr.msra.gmra.mrb[0].mxu0 %vm494_vm1, %v718_v41 }
 0x302   : > { %2052 = vmatpush3.bf16.msra.mxu0 %v2453_v5  ;;  %2067 = vmatprep.mubr.msk.bf16.mxu0 %vm2335_vm0, %v2334_v0 }
 0x303   : > { %2053 = vmatprep.subr.bf16.mxu0 %v2334_v0 }
 0x306   : > { %2054 = vmatpush3.bf16.msra.mxu0 %v2458_v7 }
 0x307   : > { %2055 = vmatprep.subr.bf16.mxu0 %v2334_v0 }
 0x30a   : > { %2056 = vmatpush3.bf16.msra.mxu0 %v2465_v8 }
 0x30b   : > { %2057 = vmatprep.subr.bf16.mxu0 %v2334_v0 }
 0x30e   : > { %2058 = vmatpush3.bf16.msra.mxu0 %v2470_v9 }
 0x30f   : > { %2059 = vmatprep.subr.bf16.mxu0 %v2334_v0 }
 0x312   : > { %2060 = vmatpush3.bf16.msra.mxu0 %v2475_v10 }
 0x313   : > { %2061 = vmatprep.subr.bf16.mxu0 %v2334_v0 }
 0x316   : > { %2062 = vmatpush3.bf16.msra.mxu0 %v2480_v11 }
 0x317   : > { %2063 = vmatprep.subr.bf16.mxu0 %v2334_v0 }
 0x31a   : > { %2064 = vmatpush3.bf16.msra.mxu0 %v2485_v12 }
 0x31b   : > { %2065 = vmatprep.subr.bf16.mxu0 %v2334_v0 }
 0x31e   : > { %2066 = vmatpush3.bf16.msra.mxu0 %v2491_v13 }
 0x31f   : > { %2099 = vmatprep.subr.bf16.mxu0 %v2334_v0 }
 0x321   : > { %2068 = vmatmul.mubr.bf16.vlgmr.msra.gmra.mrb[4].mxu0 %v1865_v42 }
 0x322   : > { %2100 = vmatpush3.bf16.msra.mxu0 %v2424_v1  ;;  %2103 = vmatprep.mubr.msk.bf16.mxu0 %vm2335_vm0, %v2334_v0 }
 0x323   : > { %2101 = vmatprep.subr.bf16.mxu0 %v2334_v0 }
 0x326   : > { %2102 = vmatpush3.bf16.msra.mxu0 %v2429_v2 }
 0x327   : > { %2107 = vmatprep.subr.bf16.mxu0 %v2334_v0 }
 0x3d4   : > { %v756_v43 = vpop.f32.mrb[0].mxu0 }
 0x3d5   : > { %v2049_v44 = vpop.f32.mrb[1].mxu0 }
 0x3d6   : > { %v759_v45 = vpop.f32.mrb[2].mxu0 }
 0x3d7   : > { %v2050_v46 = vpop.f32.mrb[3].mxu0 }
 0x3f4   : > { %v796_v47 = vpop.f32.mrb[4].mxu0 }
 0x3f5   : > { %v797_v48 = vadd.f32 %v796_v47, %v756_v43  ;;  %v2069_v49 = vpop.f32.mrb[5].mxu0 }
 0x3f6   : > { %v799_v50 = vpop.f32.mrb[6].mxu0 }
 0x3f7   : > { %v802_v51 = vadd.f32 %v2523_v20, %v797_v48  ;;  %v2070_v52 = vpop.f32.mrb[7].mxu0 }
 0x3f9   : > { %2282 = vtanh.f32 %v802_v51 }
 0x403   : > { %v2283_v53 = vpop.eup %2282 }
 0x404   : > { %808 = vrot.lane.b32.xlu1 %v2283_v53, %s2336_s18  ;;  %v804_v54 = vmul.f32 0.5, %v2283_v53 }
 0x406   : > { %v805_v55 = vadd.f32 0.5, %v804_v54 }
 0x408   : > { %v806_v58 = vmul.f32 %v805_v55, %v694_v36 }
 0x476   : > { %v809_v56 = vpop.permute.xlu1 %808 }
 0x477   : > { %v811_v57 = vmul.f32 %v809_v56, %v805_v55 }
 0x479   : > { %813 = vrot.lane.b32.xlu0 %v811_v57, %s2337_s22 }
 0x4eb   : > { %v814_v59 = vpop.permute.xlu0 %813 }
 0x4ec   : > { %v816_v60 = vadd.f32 %v814_v59, %v806_v58 }
 0x4ee   : > { %2284 = vtanh.f32 %v816_v60 }
 0x4f8   : > { %v2285_v61 = vpop.eup %2284 }
 0x4f9   : > { %819 = vrot.lane.b32.xlu1 %v2285_v61, %s2336_s18 }
 0x56b   : > { %v820_v62 = vpop.permute.xlu1 %819 }
 0x56c   : > { %v822_v63 = vmul.f32 %v820_v62, %v805_v55 }
 0x56e   : > { %v2570_v3 = vpack.c.bf16 %v822_v63, %v822_v63  ;;  %v1077_v63 = vld [vmem:[%s1076_s14] sm:$0xf]  ;;  %s1726_s14 = scalar_lea.vmem %s2853_s0, %s1892_s26 }
 0x570   : > { %838 = vrot.lane.b32.xlu0 %v2570_v3, %s2337_s22 }
 0x5e2   : > { %v839_v4 = vpop.permute.xlu0 %838 }
 0x5e3   : > { %2076 = vmatmul.mubr.msk.bf16.vlgmr.msra.gmra.mrb[8].mxu1 %vm494_vm1, %v839_v4 }
 0x5e4   : > { %2080 = vmatpush3.bf16.msra.mxu1 %v2453_v5  ;;  %2095 = vmatprep.mubr.msk.bf16.mxu1 %vm2335_vm0, %v2334_v0 }
 0x5e5   : > { %2081 = vmatprep.subr.bf16.mxu1 %v2334_v0 }
 0x5e8   : > { %2082 = vmatpush3.bf16.msra.mxu1 %v2458_v7 }
 0x5e9   : > { %2083 = vmatprep.subr.bf16.mxu1 %v2334_v0 }
 0x5ec   : > { %2084 = vmatpush3.bf16.msra.mxu1 %v2465_v8 }
 0x5ed   : > { %2085 = vmatprep.subr.bf16.mxu1 %v2334_v0 }
 0x5f0   : > { %2086 = vmatpush3.bf16.msra.mxu1 %v2470_v9 }
 0x5f1   : > { %2087 = vmatprep.subr.bf16.mxu1 %v2334_v0 }
 0x5f4   : > { %2088 = vmatpush3.bf16.msra.mxu1 %v2475_v10 }
 0x5f5   : > { %2089 = vmatprep.subr.bf16.mxu1 %v2334_v0 }
 0x5f8   : > { %2090 = vmatpush3.bf16.msra.mxu1 %v2480_v11 }
 0x5f9   : > { %2091 = vmatprep.subr.bf16.mxu1 %v2334_v0 }
 0x5fc   : > { %2092 = vmatpush3.bf16.msra.mxu1 %v2485_v12 }
 0x5fd   : > { %2093 = vmatprep.subr.bf16.mxu1 %v2334_v0 }
 0x600   : > { %2094 = vmatpush3.bf16.msra.mxu1 %v2491_v13 }
 0x601   : > { %2127 = vmatprep.subr.bf16.mxu1 %v2334_v0 }
 0x603   : > { %2096 = vmatmul.mubr.bf16.vlgmr.msra.gmra.mrb[12].mxu1 %v1871_v6 }
 0x604   : > { %2128 = vmatpush3.bf16.msra.mxu1 %v2424_v1  ;;  %2131 = vmatprep.mubr.msk.bf16.mxu1 %vm2335_vm0, %v2334_v0 }
 0x605   : > { %2129 = vmatprep.subr.bf16.mxu1 %v2334_v0 }
 0x608   : > { %2130 = vmatpush3.bf16.msra.mxu1 %v2429_v2 }
 0x609   : > { %2135 = vmatprep.subr.bf16.mxu1 %v2334_v0 }
 0x6b6   : > { %v877_v14 = vpop.f32.mrb[8].mxu1 }
 0x6b7   : > { %v2077_v15 = vpop.f32.mrb[9].mxu1 }
 0x6b8   : > { %v880_v16 = vpop.f32.mrb[10].mxu1 }
 0x6b9   : > { %v2078_v17 = vpop.f32.mrb[11].mxu1 }
 0x6d6   : > { %v917_v18 = vpop.f32.mrb[12].mxu1 }
 0x6d7   : > { %v918_v19 = vadd.f32 %v917_v18, %v877_v14  ;;  %v2097_v21 = vpop.f32.mrb[13].mxu1 }
 0x6d8   : > { %v920_v22 = vpop.f32.mrb[14].mxu1 }
 0x6d9   : > { %v923_v23 = vadd.f32 %v2523_v20, %v918_v19  ;;  %v2098_v24 = vpop.f32.mrb[15].mxu1 }
 0x6db   : > { %2286 = vtanh.f32 %v923_v23 }
 0x6e5   : > { %v2287_v25 = vpop.eup %2286 }
 0x6e6   : > { %929 = vrot.lane.b32.xlu1 %v2287_v25, %s2336_s18  ;;  %v925_v26 = vmul.f32 0.5, %v2287_v25 }
 0x6e8   : > { %v926_v27 = vadd.f32 0.5, %v925_v26 }
 0x6ea   : > { %v927_v30 = vmul.f32 %v926_v27, %v816_v60 }
 0x758   : > { %v930_v28 = vpop.permute.xlu1 %929 }
 0x759   : > { %v932_v29 = vmul.f32 %v930_v28, %v926_v27 }
 0x75b   : > { %934 = vrot.lane.b32.xlu0 %v932_v29, %s2337_s22 }
 0x7cd   : > { %v935_v31 = vpop.permute.xlu0 %934 }
 0x7ce   : > { %v937_v32 = vadd.f32 %v935_v31, %v927_v30 }
 0x7d0   : > { %2288 = vtanh.f32 %v937_v32 }
 0x7da   : > { %v2289_v33 = vpop.eup %2288 }
 0x7db   : > { %940 = vrot.lane.b32.xlu1 %v2289_v33, %s2336_s18 }
 0x84d   : > { %v941_v34 = vpop.permute.xlu1 %940 }
 0x84e   : > { %v943_v35 = vmul.f32 %v941_v34, %v926_v27 }
 0x850   : > { %v2609_v36 = vpack.c.bf16 %v943_v35, %v943_v35 }
 0x852   : > { %958 = vrot.lane.b32.xlu0 %v2609_v36, %s2337_s22 }
 0x8c4   : > { %v959_v37 = vpop.permute.xlu0 %958 }
 0x8c5   : > { %2104 = vmatmul.mubr.msk.bf16.vlgmr.msra.gmra.mrb[8].mxu0 %vm494_vm1, %v959_v37  ;;  %v1887_v37 = vld [vmem:[%s1718_s21 + $0x14] sm:$0xf]  ;;  %s2798_s21 = scalar_lea.vmem %s2859_s6, %s1908_s13 }
 0x8c6   : > { %2108 = vmatpush3.bf16.msra.mxu0 %v2453_v5  ;;  %2123 = vmatprep.mubr.msk.bf16.mxu0 %vm2335_vm0, %v2334_v0  ;;  %s1696_s9 = scalar_lea.vmem %s2798_s21, %s1864_s23  ;;  %s1192_s23 = scalar_lea.vmem %s2798_s21, %s2668_s10 }
 0x8c7   : > { %2109 = vmatprep.subr.bf16.mxu0 %v2334_v0  ;;  %s1722_s13 = scalar_lea.vmem %s2798_s21, %s1886_s15 }
 0x8ca   : > { %2110 = vmatpush3.bf16.msra.mxu0 %v2458_v7 }
 0x8cb   : > { %2111 = vmatprep.subr.bf16.mxu0 %v2334_v0 }
 0x8ce   : > { %2112 = vmatpush3.bf16.msra.mxu0 %v2465_v8 }
 0x8cf   : > { %2113 = vmatprep.subr.bf16.mxu0 %v2334_v0 }
 0x8d2   : > { %2114 = vmatpush3.bf16.msra.mxu0 %v2470_v9 }
 0x8d3   : > { %2115 = vmatprep.subr.bf16.mxu0 %v2334_v0 }
 0x8d6   : > { %2116 = vmatpush3.bf16.msra.mxu0 %v2475_v10 }
 0x8d7   : > { %2117 = vmatprep.subr.bf16.mxu0 %v2334_v0 }
 0x8da   : > { %2118 = vmatpush3.bf16.msra.mxu0 %v2480_v11 }
 0x8db   : > { %2119 = vmatprep.subr.bf16.mxu0 %v2334_v0 }
 0x8de   : > { %2120 = vmatpush3.bf16.msra.mxu0 %v2485_v12 }
 0x8df   : > { %2121 = vmatprep.subr.bf16.mxu0 %v2334_v0 }
 0x8e2   : > { %2122 = vmatpush3.bf16.msra.mxu0 %v2491_v13 }
 0x8e3   : > { %2155 = vmatprep.subr.bf16.mxu0 %v2334_v0 }
 0x8e5   : > { %2124 = vmatmul.mubr.bf16.vlgmr.msra.gmra.mrb[12].mxu0 %v1877_v38 }
 0x8e6   : > { %2156 = vmatpush3.bf16.msra.mxu0 %v2424_v1  ;;  %2159 = vmatprep.mubr.msk.bf16.mxu0 %vm2335_vm0, %v2334_v0 }
 0x8e7   : > { %2157 = vmatprep.subr.bf16.mxu0 %v2334_v0 }
 0x8ea   : > { %2158 = vmatpush3.bf16.msra.mxu0 %v2429_v2 }
 0x8eb   : > { %2163 = vmatprep.subr.bf16.mxu0 %v2334_v0 }
 0x998   : > { %v997_v39 = vpop.f32.mrb[8].mxu0 }
 0x999   : > { %v2105_v41 = vpop.f32.mrb[9].mxu0 }
 0x99a   : > { %v1000_v42 = vpop.f32.mrb[10].mxu0 }
 0x99b   : > { %v2106_v43 = vpop.f32.mrb[11].mxu0 }
 0x9b8   : > { %v1037_v44 = vpop.f32.mrb[12].mxu0 }
 0x9b9   : > { %v1038_v45 = vadd.f32 %v1037_v44, %v997_v39  ;;  %v2125_v46 = vpop.f32.mrb[13].mxu0 }
 0x9ba   : > { %v1040_v47 = vpop.f32.mrb[14].mxu0 }
 0x9bb   : > { %v1043_v48 = vadd.f32 %v2523_v20, %v1038_v45  ;;  %v2126_v49 = vpop.f32.mrb[15].mxu0 }
 0x9bd   : > { %2290 = vtanh.f32 %v1043_v48 }
 0x9c7   : > { %v2291_v50 = vpop.eup %2290 }
 0x9c8   : > { %1049 = vrot.lane.b32.xlu1 %v2291_v50, %s2336_s18  ;;  %v1045_v51 = vmul.f32 0.5, %v2291_v50 }
 0x9ca   : > { %v1046_v52 = vadd.f32 0.5, %v1045_v51 }
 0x9cc   : > { %v1047_v55 = vmul.f32 %v1046_v52, %v937_v32 }
 0xa3a   : > { %v1050_v53 = vpop.permute.xlu1 %1049 }
 0xa3b   : > { %v1052_v54 = vmul.f32 %v1050_v53, %v1046_v52 }
 0xa3d   : > { %1054 = vrot.lane.b32.xlu0 %v1052_v54, %s2337_s22 }
 0xaaf   : > { %v1055_v56 = vpop.permute.xlu0 %1054 }
 0xab0   : > { %v1057_v57 = vadd.f32 %v1055_v56, %v1047_v55 }
 0xab2   : > { %2292 = vtanh.f32 %v1057_v57 }
 0xabc   : > { %v2293_v58 = vpop.eup %2292 }
 0xabd   : > { %1060 = vrot.lane.b32.xlu1 %v2293_v58, %s2336_s18 }
 0xb2f   : > { %v1061_v59 = vpop.permute.xlu1 %1060 }
 0xb30   : > { %v1063_v60 = vmul.f32 %v1061_v59, %v1046_v52 }
 0xb32   : > { %v2648_v61 = vpack.c.bf16 %v1063_v60, %v1063_v60  ;;  %v1893_v60 = vld [vmem:[%s1726_s14 + $0x18] sm:$0xf] }
 0xb34   : > { %1078 = vrot.lane.b32.xlu0 %v2648_v61, %s2337_s22 }
 0xba6   : > { %v1079_v62 = vpop.permute.xlu0 %1078 }
 0xba7   : > { %2132 = vmatmul.mubr.msk.bf16.vlgmr.msra.gmra.mrb[16].mxu1 %vm494_vm1, %v1079_v62 }
 0xba8   : > { %2136 = vmatpush3.bf16.msra.mxu1 %v2453_v5  ;;  %2151 = vmatprep.mubr.msk.bf16.mxu1 %vm2335_vm0, %v2334_v0 }
 0xba9   : > { %2137 = vmatprep.subr.bf16.mxu1 %v2334_v0 }
 0xbac   : > { %2138 = vmatpush3.bf16.msra.mxu1 %v2458_v7 }
 0xbad   : > { %2139 = vmatprep.subr.bf16.mxu1 %v2334_v0 }
 0xbb0   : > { %2140 = vmatpush3.bf16.msra.mxu1 %v2465_v8 }
 0xbb1   : > { %2141 = vmatprep.subr.bf16.mxu1 %v2334_v0 }
 0xbb4   : > { %2142 = vmatpush3.bf16.msra.mxu1 %v2470_v9 }
 0xbb5   : > { %2143 = vmatprep.subr.bf16.mxu1 %v2334_v0 }
 0xbb8   : > { %2144 = vmatpush3.bf16.msra.mxu1 %v2475_v10 }
 0xbb9   : > { %2145 = vmatprep.subr.bf16.mxu1 %v2334_v0 }
 0xbbc   : > { %2146 = vmatpush3.bf16.msra.mxu1 %v2480_v11 }
 0xbbd   : > { %2147 = vmatprep.subr.bf16.mxu1 %v2334_v0 }
 0xbc0   : > { %2148 = vmatpush3.bf16.msra.mxu1 %v2485_v12 }
 0xbc1   : > { %2149 = vmatprep.subr.bf16.mxu1 %v2334_v0 }
 0xbc4   : > { %2150 = vmatpush3.bf16.msra.mxu1 %v2491_v13 }
 0xbc5   : > { %2183 = vmatprep.subr.bf16.mxu1 %v2334_v0 }
 0xbc7   : > { %2152 = vmatmul.mubr.bf16.vlgmr.msra.gmra.mrb[20].mxu1 %v1077_v63 }
 0xbc8   : > { %2184 = vmatpush3.bf16.msra.mxu1 %v2424_v1  ;;  %2187 = vmatprep.mubr.msk.bf16.mxu1 %vm2335_vm0, %v2334_v0 }
 0xbc9   : > { %2185 = vmatprep.subr.bf16.mxu1 %v2334_v0 }
 0xbcc   : > { %2186 = vmatpush3.bf16.msra.mxu1 %v2429_v2 }
 0xbcd   : > { %2191 = vmatprep.subr.bf16.mxu1 %v2334_v0 }
 0xc7a   : > { %v1117_v4 = vpop.f32.mrb[16].mxu1 }
 0xc7b   : > { %v2133_v6 = vpop.f32.mrb[17].mxu1 }
 0xc7c   : > { %v1120_v14 = vpop.f32.mrb[18].mxu1 }
 0xc7d   : > { %v2134_v15 = vpop.f32.mrb[19].mxu1 }
 0xc9a   : > { %v1157_v16 = vpop.f32.mrb[20].mxu1 }
 0xc9b   : > { %v1158_v17 = vadd.f32 %v1157_v16, %v1117_v4  ;;  %v2153_v18 = vpop.f32.mrb[21].mxu1 }
 0xc9c   : > { %v1160_v19 = vpop.f32.mrb[22].mxu1 }
 0xc9d   : > { %v1163_v21 = vadd.f32 %v2523_v20, %v1158_v17  ;;  %v2154_v22 = vpop.f32.mrb[23].mxu1 }
 0xc9f   : > { %2294 = vtanh.f32 %v1163_v21 }
 0xca9   : > { %v2295_v23 = vpop.eup %2294 }
 0xcaa   : > { %1169 = vrot.lane.b32.xlu1 %v2295_v23, %s2336_s18  ;;  %v1165_v24 = vmul.f32 0.5, %v2295_v23 }
 0xcac   : > { %v1166_v25 = vadd.f32 0.5, %v1165_v24 }
 0xcae   : > { %v1167_v28 = vmul.f32 %v1166_v25, %v1057_v57 }
 0xd1c   : > { %v1170_v26 = vpop.permute.xlu1 %1169 }
 0xd1d   : > { %v1172_v27 = vmul.f32 %v1170_v26, %v1166_v25 }
 0xd1f   : > { %1174 = vrot.lane.b32.xlu0 %v1172_v27, %s2337_s22 }
 0xd91   : > { %v1175_v29 = vpop.permute.xlu0 %1174 }
 0xd92   : > { %v1177_v30 = vadd.f32 %v1175_v29, %v1167_v28 }
 0xd94   : > { %2296 = vtanh.f32 %v1177_v30 }
 0xd9e   : > { %v2297_v31 = vpop.eup %2296 }
 0xd9f   : > { %1180 = vrot.lane.b32.xlu1 %v2297_v31, %s2336_s18 }
 0xe11   : > { %v1181_v32 = vpop.permute.xlu1 %1180 }
 0xe12   : > { %v1183_v33 = vmul.f32 %v1181_v32, %v1166_v25 }
 0xe14   : > { %v2688_v34 = vpack.c.bf16 %v1183_v33, %v1183_v33 }
 0xe16   : > { %1199 = vrot.lane.b32.xlu0 %v2688_v34, %s2337_s22 }
 0xe88   : > { %v1200_v35 = vpop.permute.xlu0 %1199 }
 0xe89   : > { %2160 = vmatmul.mubr.msk.bf16.vlgmr.msra.gmra.mrb[16].mxu0 %vm494_vm1, %v1200_v35 }
 0xe8a   : > { %2164 = vmatpush3.bf16.msra.mxu0 %v2453_v5  ;;  %2179 = vmatprep.mubr.msk.bf16.mxu0 %vm2335_vm0, %v2334_v0 }
 0xe8b   : > { %2165 = vmatprep.subr.bf16.mxu0 %v2334_v0 }
 0xe8e   : > { %2166 = vmatpush3.bf16.msra.mxu0 %v2458_v7 }
 0xe8f   : > { %2167 = vmatprep.subr.bf16.mxu0 %v2334_v0 }
 0xe92   : > { %2168 = vmatpush3.bf16.msra.mxu0 %v2465_v8 }
 0xe93   : > { %2169 = vmatprep.subr.bf16.mxu0 %v2334_v0 }
 0xe96   : > { %2170 = vmatpush3.bf16.msra.mxu0 %v2470_v9 }
 0xe97   : > { %2171 = vmatprep.subr.bf16.mxu0 %v2334_v0 }
 0xe9a   : > { %2172 = vmatpush3.bf16.msra.mxu0 %v2475_v10 }
 0xe9b   : > { %2173 = vmatprep.subr.bf16.mxu0 %v2334_v0 }
 0xe9e   : > { %2174 = vmatpush3.bf16.msra.mxu0 %v2480_v11 }
 0xe9f   : > { %2175 = vmatprep.subr.bf16.mxu0 %v2334_v0 }
 0xea2   : > { %2176 = vmatpush3.bf16.msra.mxu0 %v2485_v12 }
 0xea3   : > { %2177 = vmatprep.subr.bf16.mxu0 %v2334_v0 }
 0xea6   : > { %2178 = vmatpush3.bf16.msra.mxu0 %v2491_v13 }
 0xea7   : > { %2211 = vmatprep.subr.bf16.mxu0 %v2334_v0 }
 0xea9   : > { %2180 = vmatmul.mubr.bf16.vlgmr.msra.gmra.mrb[20].mxu0 %v1887_v37 }
 0xeaa   : > { %2212 = vmatpush3.bf16.msra.mxu0 %v2424_v1  ;;  %2215 = vmatprep.mubr.msk.bf16.mxu0 %vm2335_vm0, %v2334_v0 }
 0xeab   : > { %2213 = vmatprep.subr.bf16.mxu0 %v2334_v0 }
 0xeae   : > { %2214 = vmatpush3.bf16.msra.mxu0 %v2429_v2 }
 0xeaf   : > { %2219 = vmatprep.subr.bf16.mxu0 %v2334_v0 }
 0xf5c   : > { %v1238_v38 = vpop.f32.mrb[16].mxu0 }
 0xf5d   : > { %v2161_v39 = vpop.f32.mrb[17].mxu0 }
 0xf5e   : > { %v1241_v41 = vpop.f32.mrb[18].mxu0 }
 0xf5f   : > { %v2162_v42 = vpop.f32.mrb[19].mxu0 }
 0xf7c   : > { %v1278_v43 = vpop.f32.mrb[20].mxu0 }
 0xf7d   : > { %v1279_v44 = vadd.f32 %v1278_v43, %v1238_v38  ;;  %v2181_v45 = vpop.f32.mrb[21].mxu0 }
 0xf7e   : > { %v1281_v46 = vpop.f32.mrb[22].mxu0 }
 0xf7f   : > { %v1284_v47 = vadd.f32 %v2523_v20, %v1279_v44  ;;  %v2182_v1 = vpop.f32.mrb[23].mxu0 }
 0xf81   : > { %2298 = vtanh.f32 %v1284_v47 }
 0xf8b   : > { %v2299_v48 = vpop.eup %2298 }
 0xf8c   : > { %1290 = vrot.lane.b32.xlu1 %v2299_v48, %s2336_s18  ;;  %v1286_v49 = vmul.f32 0.5, %v2299_v48 }
 0xf8e   : > { %v1287_v50 = vadd.f32 0.5, %v1286_v49 }
 0xf90   : > { %v1288_v52 = vmul.f32 %v1287_v50, %v1177_v30 }
 0xffe   : > { %v1291_v2 = vpop.permute.xlu1 %1290 }
 0xfff   : > { %v1293_v51 = vmul.f32 %v1291_v2, %v1287_v50 }
0x1001   : > { %1295 = vrot.lane.b32.xlu0 %v1293_v51, %s2337_s22 }
0x1073   : > { %v1296_v53 = vpop.permute.xlu0 %1295 }
0x1074   : > { %v1298_v54 = vadd.f32 %v1296_v53, %v1288_v52 }
0x1076   : > { %2300 = vtanh.f32 %v1298_v54 }
0x1080   : > { %v2301_v55 = vpop.eup %2300 }
0x1081   : > { %1301 = vrot.lane.b32.xlu1 %v2301_v55, %s2336_s18 }
0x10f3   : > { %v1302_v56 = vpop.permute.xlu1 %1301 }
0x10f4   : > { %v1304_v57 = vmul.f32 %v1302_v56, %v1287_v50 }
0x10f6   : > { %v2727_v58 = vpack.c.bf16 %v1304_v57, %v1304_v57 }
0x10f8   : > { %1320 = vrot.lane.b32.xlu0 %v2727_v58, %s2337_s22 }
0x116a   : > { %v1321_v59 = vpop.permute.xlu0 %1320 }
0x116b   : > { %2188 = vmatmul.mubr.msk.bf16.vlgmr.msra.gmra.mrb[24].mxu1 %vm494_vm1, %v1321_v59 }
0x116c   : > { %2192 = vmatpush3.bf16.msra.mxu1 %v2453_v5  ;;  %2207 = vmatprep.mubr.msk.bf16.mxu1 %vm2335_vm0, %v2334_v0 }
0x116d   : > { %2193 = vmatprep.subr.bf16.mxu1 %v2334_v0 }
0x1170   : > { %2194 = vmatpush3.bf16.msra.mxu1 %v2458_v7 }
0x1171   : > { %2195 = vmatprep.subr.bf16.mxu1 %v2334_v0 }
0x1174   : > { %2196 = vmatpush3.bf16.msra.mxu1 %v2465_v8 }
0x1175   : > { %2197 = vmatprep.subr.bf16.mxu1 %v2334_v0 }
0x1178   : > { %2198 = vmatpush3.bf16.msra.mxu1 %v2470_v9 }
0x1179   : > { %2199 = vmatprep.subr.bf16.mxu1 %v2334_v0 }
0x117c   : > { %2200 = vmatpush3.bf16.msra.mxu1 %v2475_v10 }
0x117d   : > { %2201 = vmatprep.subr.bf16.mxu1 %v2334_v0 }
0x1180   : > { %2202 = vmatpush3.bf16.msra.mxu1 %v2480_v11 }
0x1181   : > { %2203 = vmatprep.subr.bf16.mxu1 %v2334_v0 }
0x1184   : > { %2204 = vmatpush3.bf16.msra.mxu1 %v2485_v12 }
0x1185   : > { %2205 = vmatprep.subr.bf16.mxu1 %v2334_v0 }
0x1188   : > { %2206 = vmatpush3.bf16.msra.mxu1 %v2491_v13 }
0x118b   : > { %2208 = vmatmul.mubr.bf16.vlgmr.msra.gmra.mrb[28].mxu1 %v1893_v60 }
0x123e   : > { %v1359_v62 = vpop.f32.mrb[24].mxu1 }
0x123f   : > { %v2189_v63 = vpop.f32.mrb[25].mxu1 }
0x1240   : > { %v1362_v4 = vpop.f32.mrb[26].mxu1 }
0x1241   : > { %v2190_v6 = vpop.f32.mrb[27].mxu1 }
0x125e   : > { %v1399_v14 = vpop.f32.mrb[28].mxu1 }
0x125f   : > { %v1400_v15 = vadd.f32 %v1399_v14, %v1359_v62  ;;  %v2209_v16 = vpop.f32.mrb[29].mxu1 }
0x1260   : > { %v1402_v17 = vpop.f32.mrb[30].mxu1 }
0x1261   : > { %v1405_v18 = vadd.f32 %v2523_v20, %v1400_v15  ;;  %v2210_v19 = vpop.f32.mrb[31].mxu1 }
0x1263   : > { %2302 = vtanh.f32 %v1405_v18 }
0x126d   : > { %v2303_v21 = vpop.eup %2302 }
0x126e   : > { %1411 = vrot.lane.b32.xlu1 %v2303_v21, %s2336_s18  ;;  %v1407_v22 = vmul.f32 0.5, %v2303_v21 }
0x1270   : > { %v1408_v23 = vadd.f32 0.5, %v1407_v22 }
0x1272   : > { %v1409_v26 = vmul.f32 %v1408_v23, %v1298_v54 }
0x12e0   : > { %v1412_v24 = vpop.permute.xlu1 %1411 }
0x12e1   : > { %v1414_v25 = vmul.f32 %v1412_v24, %v1408_v23 }
0x12e3   : > { %1416 = vrot.lane.b32.xlu0 %v1414_v25, %s2337_s22 }
0x1355   : > { %v1417_v27 = vpop.permute.xlu0 %1416 }
0x1356   : > { %v1419_v28 = vadd.f32 %v1417_v27, %v1409_v26 }
0x1358   : > { %2304 = vtanh.f32 %v1419_v28 }
0x1362   : > { %v2305_v29 = vpop.eup %2304 }
0x1363   : > { %1422 = vrot.lane.b32.xlu1 %v2305_v29, %s2336_s18 }
0x13d5   : > { %v1423_v30 = vpop.permute.xlu1 %1422 }
0x13d6   : > { %v1425_v31 = vmul.f32 %v1423_v30, %v1408_v23 }
0x13d8   : > { %v1426_v32 = vpack.c.bf16 %v1425_v31, %v1425_v31 }
0x13da   : > { %1441 = vrot.lane.b32.xlu0 %v1426_v32, %s2337_s22 }
0x144c   : > { %v1442_v33 = vpop.permute.xlu0 %1441 }
0x144d   : > { %2216 = vmatmul.mubr.msk.bf16.vlgmr.msra.gmra.mrb[24].mxu0 %vm494_vm1, %v1442_v33 }
0x144e   : > { %2220 = vmatpush3.bf16.msra.mxu0 %v2453_v5  ;;  %2235 = vmatprep.mubr.msk.bf16.mxu0 %vm2335_vm0, %v2334_v0  ;;  %v1899_v5 = vld [vmem:[%s1734_s11 + $0x1c] sm:$0xf]  ;;  %s709_s11 = scalar_lea.vmem %s2798_s21, %s1909_s25  ;;  %s1704_s25 = scalar_lea.vmem %s2798_s21, %s1870_s12 }
0x144f   : > { %2221 = vmatprep.subr.bf16.mxu0 %v2334_v0  ;;  %s2338_s12 = smov 96  }
0x1452   : > { %2222 = vmatpush3.bf16.msra.mxu0 %v2458_v7 }
0x1453   : > { %2223 = vmatprep.subr.bf16.mxu0 %v2334_v0 }
0x1456   : > { %2224 = vmatpush3.bf16.msra.mxu0 %v2465_v8 }
0x1457   : > { %2225 = vmatprep.subr.bf16.mxu0 %v2334_v0 }
0x145a   : > { %2226 = vmatpush3.bf16.msra.mxu0 %v2470_v9 }
0x145b   : > { %2227 = vmatprep.subr.bf16.mxu0 %v2334_v0 }
0x145e   : > { %2228 = vmatpush3.bf16.msra.mxu0 %v2475_v10 }
0x145f   : > { %2229 = vmatprep.subr.bf16.mxu0 %v2334_v0 }
0x1462   : > { %2230 = vmatpush3.bf16.msra.mxu0 %v2480_v11 }
0x1463   : > { %2231 = vmatprep.subr.bf16.mxu0 %v2334_v0 }
0x1466   : > { %2232 = vmatpush3.bf16.msra.mxu0 %v2485_v12 }
0x1467   : > { %2233 = vmatprep.subr.bf16.mxu0 %v2334_v0 }
0x146a   : > { %2234 = vmatpush3.bf16.msra.mxu0 %v2491_v13 }
0x146d   : > { %2236 = vmatmul.mubr.bf16.vlgmr.msra.gmra.mrb[28].mxu0 %v1899_v5 }
0x1520   : > { %v1480_v7 = vpop.f32.mrb[24].mxu0 }
0x1521   : > { %v2217_v8 = vpop.f32.mrb[25].mxu0 }
0x1522   : > { %v1483_v9 = vpop.f32.mrb[26].mxu0 }
0x1523   : > { %v2218_v10 = vpop.f32.mrb[27].mxu0 }
0x1540   : > { %v1520_v11 = vpop.f32.mrb[28].mxu0 }
0x1541   : > { %v1521_v35 = vadd.f32 %v1520_v11, %v1480_v7  ;;  %v2237_v37 = vpop.f32.mrb[29].mxu0 }
0x1542   : > { %v1523_v12 = vpop.f32.mrb[30].mxu0 }
0x1543   : > { %v1526_v0 = vadd.f32 %v2523_v20, %v1521_v35  ;;  %v2238_v38 = vpop.f32.mrb[31].mxu0 }
0x1545   : > { %2306 = vtanh.f32 %v1526_v0 }
0x154f   : > { %v2307_v39 = vpop.eup %2306 }
0x1550   : > { %1532 = vrot.lane.b32.xlu1 %v2307_v39, %s2336_s18  ;;  %v1528_v13 = vmul.f32 0.5, %v2307_v39 }
0x1552   : > { %v1529_v41 = vadd.f32 0.5, %v1528_v13 }
0x1554   : > { %v1530_v20 = vmul.f32 %v1529_v41, %v1419_v28 }
0x15c2   : > { %v1533_v42 = vpop.permute.xlu1 %1532 }
0x15c3   : > { %v1535_v43 = vmul.f32 %v1533_v42, %v1529_v41 }
0x15c5   : > { %1537 = vrot.lane.b32.xlu0 %v1535_v43, %s2337_s22 }
0x15c9   : > { %705 = vrot.lane.b32.xlu0 %v2531_v40, %s2337_s22 }
0x15cd   : > { %948 = vrot.lane.b32.xlu0 %v2609_v36, %s2337_s22 }
0x15d1   : > { %1188 = vrot.lane.b32.xlu0 %v2688_v34, %s2337_s22 }
0x15d5   : > { %1430 = vrot.lane.b32.xlu0 %v1426_v32, %s2337_s22 }
0x1637   : > { %v1538_v44 = vpop.permute.xlu0 %1537 }
0x1638   : > { %v1540_v40 = vadd.f32 %v1538_v44, %v1530_v20 }
0x163a   : > { %2308 = vtanh.f32 %v1540_v40 }
0x163b   : > { %v706_v36 = vpop.permute.xlu0 %705 }
0x163c   : > { %711 = vst.msk [vmem:[%s709_s11] sm:$0xf] %vm710_vm2, %v706_v36 }
0x163f   : > { %v949_v46 = vpop.permute.xlu0 %948 }
0x1644   : > { %v2309_v34 = vpop.eup %2308 }
0x1645   : > { %1543 = vrot.lane.b32.xlu1 %v2309_v34, %s2336_s18  ;;  %s1710_s18 = scalar_lea.vmem %s2798_s21, %s1876_s16  ;;  %s1738_s16 = scalar_lea.vmem %s2798_s21, %s1898_s19 }
0x1649   : > { %827 = vrot.lane.b32.xlu1 %v2570_v3, %s2337_s22 }
0x164d   : > { %1068 = vrot.lane.b32.xlu1 %v2648_v61, %s2337_s22  ;;  %v1189_v61 = vpop.permute.xlu0 %1188 }
0x1651   : > { %1309 = vrot.lane.b32.xlu1 %v2727_v58, %s2337_s22  ;;  %v1431_v50 = vpop.permute.xlu0 %1430 }
0x16b7   : > { %v1544_v45 = vpop.permute.xlu1 %1543 }
0x16b8   : > { %v1546_v47 = vmul.f32 %v1544_v45, %v1529_v41 }
0x16ba   : > { %v1918_v1 = vpack.c.bf16 %v1546_v47, %v1546_v47  ;;  %1558 = vrot.lane.b32.xlu0 %v1546_v47, %s2337_s22 }
0x16bb   : > { %v828_v3 = vpop.permute.xlu1 %827 }
0x16bc   : > { %1869 = vst.msk [vmem:[%s1696_s9 + $0x4] sm:$0xf] %vm710_vm2, %v828_v3  ;;  %1551 = vrot.lane.b32.xlu1 %v1918_v1, %s2337_s22  ;;  %s1730_s22 = scalar_lea.vmem %s2798_s21, %s1892_s26 }
0x16bd   : > { %1875 = vst.msk [vmem:[%s1704_s25 + $0x8] sm:$0xf] %vm710_vm2, %v949_v46 }
0x16bf   : > { %v1069_v48 = vpop.permute.xlu1 %1068 }
0x16c0   : > { %1881 = vst.msk [vmem:[%s1710_s18 + $0xc] sm:$0xf] %vm710_vm2, %v1069_v48  ;;  %1563 = vrot.lane.b32.xlu1 %v1540_v40, %s2338_s12 }
0x16c1   : > { %1193 = vst.msk [vmem:[%s1192_s23] sm:$0xf] %vm710_vm2, %v1189_v61 }
0x16c3   : > { %v1310_v49 = vpop.permute.xlu1 %1309 }
0x16c4   : > { %1891 = vst.msk [vmem:[%s1722_s13 + $0x14] sm:$0xf] %vm710_vm2, %v1310_v49 }
0x16c5   : > { %1897 = vst.msk [vmem:[%s1730_s22 + $0x18] sm:$0xf] %vm710_vm2, %v1431_v50 }
0x172c   : > { %v1559_v2 = vpop.permute.xlu0 %1558 }
0x172d   : > { %1561 = vst.msk [vmem:[%s2439_s24] sm:$0xff] %vm494_vm1, %v1559_v2 }
0x172e   : > { %v1552_v51 = vpop.permute.xlu1 %1551 }
0x172f   : > { %1903 = vst.msk [vmem:[%s1738_s16 + $0x1c] sm:$0xf] %vm710_vm2, %v1552_v51 }
0x1732   : > { %v1564_v52 = vpop.permute.xlu1 %1563 }
0x1733   : > { %1566 = vst.msk [vmem:[%s2515_s17] sm:$0xff] %vm494_vm1, %v1564_v52 }
0x1734 PF: > { %s19_s29 = sadd.s32 1, %s2332_s29   ;;  %s2862_s27 = smov %s2328_s28 }
0x1735   : > { %p16_p5 = scmp.ge.s32.totalorder %s19_s29, 4   ;;  %s2863_s28 = smov %s2865_s30 }
0x1737   :  { %18 = sbr.rel (!%p16_p5) target bundleno = 2 (0x2), region = 133 }

</bundles_post_ra>
